<compile_context>
chip_gen: v5e
topology: v5e:2x2
jax: 0.10.0
libtpu: 0.0.40
codegen_flags: <defaults>
</compile_context>

<pallas_src>
import jax
import jax.numpy as jnp
from jax.experimental import pallas as pl
from jax.experimental.pallas import tpu as pltpu


def _vq_kernel(x_ref, cbt_ref, cbf_ref, e2h_ref, q_ref, idx_ref, loss_ref):
    x = x_ref[...]                       # (TN, C) f32
    cbt = cbt_ref[...]                   # (C, K)  score dtype (f32 or bf16)
    cbf = cbf_ref[...]                   # (K, C)  f32 (exact gather operand)
    e2h = e2h_ref[...]                   # (1, K)  f32, 0.5 * |e_k|^2 (hoisted)

    tn = x.shape[0]
    k = cbf.shape[0]

    # Nearest-code score: argmin_k 0.5*|e_k|^2 - x.e_k  ==  argmin_k |x - e_k|^2
    xe = jnp.dot(x.astype(cbt.dtype), cbt,
                 preferred_element_type=jnp.float32)            # (TN, K) MXU
    score = e2h - xe                                            # f32 VPU
    idx = jnp.argmin(score, axis=-1)                            # (TN,) int32

    # Gather codebook rows via one-hot matmul in f32 (exact rows, MXU).
    onehot = (jax.lax.broadcasted_iota(jnp.int32, (tn, k), 1)
              == idx[:, None]).astype(jnp.float32)              # (TN, K)
    q = jnp.dot(onehot, cbf, preferred_element_type=jnp.float32)  # (TN, C)

    q_ref[...] = q.astype(q_ref.dtype)
    idx_ref[...] = idx[None, None, :].astype(jnp.int32)          # lane-dense row

    # Per-tile partial loss (lane 0 of a full 128-lane row; summed in wrapper).
    diff = q - x
    tile_loss = jnp.sum(diff * diff)
    lane = jax.lax.broadcasted_iota(jnp.int32, (1, 1, 128), 2)
    loss_ref[...] = jnp.where(lane == 0, tile_loss, jnp.float32(0.0))


def _pick_token_tile(n, k, desired):
    # Bound the (tile, K) f32 intermediates (scores + one-hot) to ~8 MiB so
    # huge codebooks don't blow VMEM / spill vregs; prefer multiples of 128.
    budget = 8 * 1024 * 1024
    cap = max(8, budget // max(1, 8 * k))
    desired = max(8, min(desired, cap))
    for t in (512, 384, 256, 128, 64, 32, 16, 8):
        if t <= desired and n % t == 0:
            return t
    return n  # odd / tiny N: single full block


def quantize_forward(x, codebook, *, token_tile=256, score_dtype=jnp.float32):
    """x: (B, C, H, W) float32; codebook: (K, C) float32.

    score_dtype: operand dtype for the distance matmul only.  jnp.bfloat16 is
    a valid fast path on bf16-native MXUs (v6e/v7x); nearest-code selection
    may flip on numerical ties vs. f32.  Gathered values stay exact f32 rows.

    Returns (quant_out (B,C,H,W), losses dict, indices (B,H,W))."""
    B, C, H, W = x.shape
    K, Cc = codebook.shape
    assert C == Cc
    N = B * H * W

    tile = _pick_token_tile(N, K, token_tile)
    num_tiles = N // tile

    x32 = x.astype(jnp.float32)
    cb32 = codebook.astype(jnp.float32)

    # NCHW -> NHWC -> (N, C); hoisted codebook-side invariants.
    x_flat = jnp.transpose(x32, (0, 2, 3, 1)).reshape(N, C)
    cbt = cb32.T.astype(score_dtype)                         # (C, K) score operand
    e2_half = 0.5 * jnp.sum(cb32 * cb32, axis=-1)[None, :]   # (1, K) f32

    score_bytes = jnp.dtype(score_dtype).itemsize
    cost = pl.CostEstimate(
        flops=4 * N * K * C,                  # distance matmul + one-hot gather
        transcendentals=0,
        bytes_accessed=int(N * C * 4 * 2      # x in, q out
                           + N * 4            # indices
                           + K * C * (4 + score_bytes) + K * 4
                           + num_tiles * 128 * 4),
    )

    vmem_est = (2 * tile * C * 4 * 2                       # x + q, double-buffered
                + 2 * (K * C * 4 + K * C * score_bytes + K * 4)  # resident codebooks
                + 2 * (tile * 4 + 128 * 4)                 # idx + loss blocks
                + tile * K * (8 + score_bytes)             # score/one-hot/xe temps
                + (2 << 20))
    vmem_limit = int(min(max(2 * vmem_est, 32 << 20), 64 << 20))

    q_flat, idx_tiles, loss_parts = pl.pallas_call(
        _vq_kernel,
        out_shape=(
            jax.ShapeDtypeStruct((N, C), jnp.float32),
            jax.ShapeDtypeStruct((num_tiles, 1, tile), jnp.int32),
            jax.ShapeDtypeStruct((num_tiles, 1, 128), jnp.float32),
        ),
        grid_spec=pltpu.PrefetchScalarGridSpec(
            num_scalar_prefetch=0,
            grid=(num_tiles,),
            in_specs=[
                pl.BlockSpec((tile, C), lambda i: (i, 0)),   # x tile
                pl.BlockSpec((C, K), lambda i: (0, 0)),      # codebook^T (scores)
                pl.BlockSpec((K, C), lambda i: (0, 0)),      # codebook f32 (gather)
                pl.BlockSpec((1, K), lambda i: (0, 0)),      # 0.5*|e|^2 (hoisted)
            ],
            out_specs=[
                pl.BlockSpec((tile, C), lambda i: (i, 0)),        # quantized tile
                pl.BlockSpec((1, 1, tile), lambda i: (i, 0, 0)),  # indices (lane-dense)
                pl.BlockSpec((1, 1, 128), lambda i: (i, 0, 0)),   # per-tile loss
            ],
        ),
        compiler_params=pltpu.CompilerParams(
            dimension_semantics=("parallel",),   # independent tiles -> megacore
            vmem_limit_bytes=vmem_limit,
        ),
        cost_estimate=cost,
    )(x_flat, cbt, cb32, e2_half)

    mse = jnp.sum(loss_parts) / jnp.float32(N * C)
    losses = {"codebook_loss": mse, "commitment_loss": mse}

    # Straight-through: forward value of quant_out equals the gathered code.
    # TODO(synk): the .detach()-based gradient routing has no forward effect
    # and is not representable in a forward-only kernel.
    quant_out = q_flat.reshape(B, H, W, C).transpose(0, 3, 1, 2)
    min_encoding_indices = idx_tiles.reshape(N).reshape(B, H, W)
    return quant_out, losses, min_encoding_indices


def _reference(x, codebook):
    B, C, H, W = x.shape
    xf = jnp.transpose(x, (0, 2, 3, 1)).reshape(-1, C)
    dist = (jnp.sum(xf ** 2, -1, keepdims=True)
            + jnp.sum(codebook ** 2, -1)[None, :]
            - 2.0 * xf @ codebook.T)
    idx = jnp.argmin(dist, axis=-1)
    q = codebook[idx]
    mse = jnp.mean((q - xf) ** 2)
    quant = q.reshape(B, H, W, C).transpose(0, 3, 1, 2)
    return quant, mse, idx.reshape(B, H, W)


if __name__ == "__main__":
    # Small shapes consistent with the module's forward.
    B, C, H, W = 2, 32, 16, 16        # z_channels = 32, N = 512 tokens
    codebook_size = 128

    key = jax.random.PRNGKey(0)
    kx, kc = jax.random.split(key)
    x = jax.random.normal(kx, (B, C, H, W), dtype=jnp.float32)
    # nn.Embedding default init: N(0, 1)
    codebook = jax.random.normal(kc, (codebook_size, C), dtype=jnp.float32)

    q_ref, mse_ref, idx_ref = _reference(x, codebook)

    # Exact path (f32 scores): matches module forward semantics bit-for-bit.
    quant_out, losses, indices = quantize_forward(x, codebook,
                                                  score_dtype=jnp.float32)
    jax.block_until_ready(quant_out)
    jax.block_until_ready(losses["codebook_loss"])
    jax.block_until_ready(indices)

    assert quant_out.shape == (B, C, H, W)
    assert indices.shape == (B, H, W)
    assert jnp.array_equal(indices, idx_ref)
    assert jnp.allclose(quant_out, q_ref, atol=1e-5)
    assert jnp.allclose(losses["codebook_loss"], mse_ref, rtol=1e-5, atol=1e-6)
    assert jnp.allclose(losses["commitment_loss"], mse_ref, rtol=1e-5, atol=1e-6)

    print("KERNEL_OK")
</pallas_src>

<mosaic_0001>
module attributes {stable_mosaic.version = 11 : i64} {
  func.func @_vq_kernel(%arg0: i32, %arg1: memref<256x32xf32, #tpu.memory_space<vmem>>, %arg2: memref<32x128xf32, #tpu.memory_space<vmem>>, %arg3: memref<128x32xf32, #tpu.memory_space<vmem>>, %arg4: memref<1x128xf32, #tpu.memory_space<vmem>>, %arg5: memref<256x32xf32, #tpu.memory_space<vmem>>, %arg6: memref<1x1x256xi32, #tpu.memory_space<vmem>>, %arg7: memref<1x1x128xf32, #tpu.memory_space<vmem>>) attributes {dimension_semantics = [#tpu.dimension_semantics<parallel>], iteration_bounds = array<i64: 2>, scalar_prefetch = 0 : i64, scratch_operands = 0 : i64, tpu.core_type = #tpu.core_type<tc>, window_params = [{transform_indices = @transform_0, window_bounds = array<i64: 256, 32>}, {pipeline_mode = #tpu.pipeline_mode<synchronous>, transform_indices = @transform_1, window_bounds = array<i64: 32, 128>}, {pipeline_mode = #tpu.pipeline_mode<synchronous>, transform_indices = @transform_2, window_bounds = array<i64: 128, 32>}, {pipeline_mode = #tpu.pipeline_mode<synchronous>, transform_indices = @transform_3, window_bounds = array<i64: 1, 128>}, {transform_indices = @transform_4, window_bounds = array<i64: 256, 32>}, {transform_indices = @transform_5, window_bounds = array<i64: 1, 1, 256>}, {transform_indices = @transform_6, window_bounds = array<i64: 1, 1, 128>}]} {
    %c0 = arith.constant 0 : index
    %c0_0 = arith.constant 0 : index
    %0 = vector.load %arg1[%c0, %c0_0] : memref<256x32xf32, #tpu.memory_space<vmem>>, vector<256x32xf32>
    %c0_1 = arith.constant 0 : index
    %c0_2 = arith.constant 0 : index
    %1 = vector.load %arg2[%c0_1, %c0_2] : memref<32x128xf32, #tpu.memory_space<vmem>>, vector<32x128xf32>
    %c0_3 = arith.constant 0 : index
    %c0_4 = arith.constant 0 : index
    %2 = vector.load %arg3[%c0_3, %c0_4] : memref<128x32xf32, #tpu.memory_space<vmem>>, vector<128x32xf32>
    %c0_5 = arith.constant 0 : index
    %c0_6 = arith.constant 0 : index
    %3 = vector.load %arg4[%c0_5, %c0_6] : memref<1x128xf32, #tpu.memory_space<vmem>>, vector<1x128xf32>
    %cst = arith.constant dense<0.000000e+00> : vector<256x128xf32>
    %4 = tpu.matmul %0, %1, %cst {dimension_numbers = #tpu.dot_dimension_numbers<[1], [0], [0], [1], [0, 0, 1, 1], [], []>} : vector<256x32xf32>, vector<32x128xf32>, vector<256x128xf32> -> vector<256x128xf32>
    %5 = vector.broadcast %3 : vector<1x128xf32> to vector<256x128xf32>
    %6 = arith.subf %5, %4 : vector<256x128xf32>
    %7 = tpu.reduce_index %6 {axis = 1 : i32, kind = #tpu.reduction_kind<arg_min>} : vector<256x128xf32> -> vector<256xi32>
    %8 = tpu.iota {dimensions = array<i32: 1>} : vector<256x128xi32>
    %9 = vector.shape_cast %7 : vector<256xi32> to vector<256x1xi32>
    %10 = vector.broadcast %9 : vector<256x1xi32> to vector<256x128xi32>
    %11 = arith.cmpi eq, %8, %10 : vector<256x128xi32>
    %12 = arith.extui %11 : vector<256x128xi1> to vector<256x128xi32>
    %13 = arith.sitofp %12 : vector<256x128xi32> to vector<256x128xf32>
    %cst_7 = arith.constant dense<0.000000e+00> : vector<256x32xf32>
    %14 = tpu.matmul %13, %2, %cst_7 {dimension_numbers = #tpu.dot_dimension_numbers<[1], [0], [0], [1], [0, 0, 1, 1], [], []>} : vector<256x128xf32>, vector<128x32xf32>, vector<256x32xf32> -> vector<256x32xf32>
    %c0_8 = arith.constant 0 : index
    %c0_9 = arith.constant 0 : index
    %15 = vector.load %arg5[%c0_8, %c0_9] : memref<256x32xf32, #tpu.memory_space<vmem>>, vector<256x32xf32>
    tpu.vector_store %arg5[%c0_8, %c0_9], %14 {strides = array<i32>} : memref<256x32xf32, #tpu.memory_space<vmem>>, vector<256x32xf32>,
    %16 = vector.shape_cast %7 : vector<256xi32> to vector<1x1x256xi32>
    %c0_10 = arith.constant 0 : index
    %c0_11 = arith.constant 0 : index
    %c0_12 = arith.constant 0 : index
    %17 = vector.load %arg6[%c0_10, %c0_11, %c0_12] : memref<1x1x256xi32, #tpu.memory_space<vmem>>, vector<1x1x256xi32>
    tpu.vector_store %arg6[%c0_10, %c0_11, %c0_12], %16 {strides = array<i32>} : memref<1x1x256xi32, #tpu.memory_space<vmem>>, vector<1x1x256xi32>,
    %18 = arith.subf %14, %0 : vector<256x32xf32>
    %19 = arith.mulf %18, %18 : vector<256x32xf32>
    %20 = vector.shape_cast %19 : vector<256x32xf32> to vector<1x256x32xf32>
    %cst_13 = arith.constant dense<0.000000e+00> : vector<1xf32>
    %21 = vector.multi_reduction <add>, %20, %cst_13 [1, 2] : vector<1x256x32xf32> to vector<1xf32>
    %22 = vector.shape_cast %21 : vector<1xf32> to vector<1x1x1xf32>
    %23 = vector.extract %22[0, 0, 0] : f32 from vector<1x1x1xf32>
    %24 = tpu.iota {dimensions = array<i32: 2>} : vector<1x1x128xi32>
    %c0_i32 = arith.constant 0 : i32
    %25 = vector.broadcast %c0_i32 : i32 to vector<1x1x128xi32>
    %26 = arith.cmpi eq, %24, %25 : vector<1x1x128xi32>
    %cst_14 = arith.constant 0.000000e+00 : f32
    %27 = vector.broadcast %23 : f32 to vector<1x1x128xf32>
    %28 = vector.broadcast %cst_14 : f32 to vector<1x1x128xf32>
    %29 = arith.select %26, %27, %28 : vector<1x1x128xi1>, vector<1x1x128xf32>
    %c0_15 = arith.constant 0 : index
    %c0_16 = arith.constant 0 : index
    %c0_17 = arith.constant 0 : index
    %30 = vector.load %arg7[%c0_15, %c0_16, %c0_17] : memref<1x1x128xf32, #tpu.memory_space<vmem>>, vector<1x1x128xf32>
    tpu.vector_store %arg7[%c0_15, %c0_16, %c0_17], %29 {strides = array<i32>} : memref<1x1x128xf32, #tpu.memory_space<vmem>>, vector<1x1x128xf32>,
    return
  }
  func.func @transform_0(%arg0: i32) -> (i32, i32) {
    %c0_i32 = arith.constant 0 : i32
    %c0_i32_0 = arith.constant 0 : i32
    return %arg0, %c0_i32 : i32, i32
  }
  func.func @transform_1(%arg0: i32) -> (i32, i32) {
    %c0_i32 = arith.constant 0 : i32
    %c0_i32_0 = arith.constant 0 : i32
    %c0_i32_1 = arith.constant 0 : i32
    return %c0_i32, %c0_i32_0 : i32, i32
  }
  func.func @transform_2(%arg0: i32) -> (i32, i32) {
    %c0_i32 = arith.constant 0 : i32
    %c0_i32_0 = arith.constant 0 : i32
    %c0_i32_1 = arith.constant 0 : i32
    return %c0_i32, %c0_i32_0 : i32, i32
  }
  func.func @transform_3(%arg0: i32) -> (i32, i32) {
    %c0_i32 = arith.constant 0 : i32
    %c0_i32_0 = arith.constant 0 : i32
    %c0_i32_1 = arith.constant 0 : i32
    return %c0_i32, %c0_i32_0 : i32, i32
  }
  func.func @transform_4(%arg0: i32) -> (i32, i32) {
    %c0_i32 = arith.constant 0 : i32
    %c0_i32_0 = arith.constant 0 : i32
    return %arg0, %c0_i32 : i32, i32
  }
  func.func @transform_5(%arg0: i32) -> (i32, i32, i32) {
    %c0_i32 = arith.constant 0 : i32
    %c0_i32_0 = arith.constant 0 : i32
    %c0_i32_1 = arith.constant 0 : i32
    return %arg0, %c0_i32, %c0_i32_0 : i32, i32, i32
  }
  func.func @transform_6(%arg0: i32) -> (i32, i32, i32) {
    %c0_i32 = arith.constant 0 : i32
    %c0_i32_0 = arith.constant 0 : i32
    %c0_i32_1 = arith.constant 0 : i32
    return %arg0, %c0_i32, %c0_i32_0 : i32, i32, i32
  }
}

</mosaic_0001>

<bundles_post_ra>
// kernel: tpu_custom_call.1
= control target key start
LH: loop header
LB: loop body
LE: loop exit
PB: predicated region body
PF: predicated region fallthrough
CT: control target
= control target key end

     0   :  { %12 = vsyncpa [#allocation3], 0  ;;  %s3217_s0 = inlined_call_operand.vmem [shape: f32[512,32], index: 0, kind: input, shape index: {}]   ;;  %s3218_s1 = inlined_call_operand.vmem [shape: f32[32,128], index: 1, kind: input, shape index: {}]   ;;  %s3219_s2 = inlined_call_operand.vmem [shape: f32[128,32], index: 2, kind: input, shape index: {}]   ;;  %s3220_s3 = inlined_call_operand.vmem [shape: f32[1,128], index: 3, kind: input, shape index: {}]   ;;  %s3221_s4 = inlined_call_operand.vmem [shape: f32[512,32], index: 4, kind: output, shape index: {0}]   ;;  %s3222_s5 = inlined_call_operand.hbm [shape: s32[2,1,256], index: 5, kind: output, shape index: {1}]   ;;  %s3223_s6 = inlined_call_operand.hbm [shape: f32[2,1,128], index: 6, kind: output, shape index: {2}]  }
   0x1   :  { %14 = vsyncpa [#allocation3 + $0x1], 0 }
   0x2   :  { %15 = vsyncpa [#allocation5], 0 }
   0x3   :  { %17 = vsyncpa [#allocation5 + $0x1], 0  ;;  %s2280_s21 = smov 0   ;;  %s2282_s22 = smov 0  }
   0x4   :  { %s2284_s23 = smov 0   ;;  %s2286_s24 = smov 0  }
   0x5 LB: > { %s2301_s25 = sadd.s32 4294967295, %s2241_s24   ;;  %s1921_s26 = sadd.s32 4294967294, %s2241_s24   ;;  %s2241_s24 = sphi %s2286_s24, %s3229_s24   ;;  %s2237_s23 = sphi %s2284_s23, %s3228_s23   ;;  %s2233_s22 = sphi %s2282_s22, %s3227_s22   ;;  %s2229_s21 = sphi %s2280_s21, %s3226_s21  }
   0x6   : > { %s2305_s27 = sadd.s32 1, %s2241_s24   ;;  %s145_s28 = sadd.s32 1, %s2237_s23 }
   0x7   : > { %s142_s29 = ssub.s32 %s2241_s24, %s2305_s27  ;;  %p155_p0 = scmp.ne.s32.totalorder %s2237_s23, %s2233_s22 }
   0x8   : > { %p143_p1 = scmp.eq.s32.totalorder %s142_s29, 0  ;;  %p156_p2 = scmp.eq.s32.totalorder %s2301_s25, 1 }
   0x9   : > { %p161_p3 = scmp.ne.s32.totalorder %s2233_s22, %s2229_s21  ;;  %p162_p4 = scmp.eq.s32.totalorder %s1921_s26, 1 }
   0xa   : > { %s2316_s30 = scalar_select %p143_p1, %s2237_s23, %s145_s28  }
   0xb   : > { %p2318_p5 = por %p156_p2, %p155_p0  ;;  %p2322_p6 = por %p162_p4, %p161_p3 }
   0xc   : > { %p1924_p7 = scmp.ge.s32.totalorder %s2241_s24, 1  ;;  %p224_p8 = scmp.lt.s32.totalorder %s2241_s24, 3 }
   0xe   : > { %p225_p9 = pnand %p1924_p7, %p224_p8 }
   0xf   : > { %s1926_s13 = sshll.u32 (!%p225_p9), %s2301_s25, 5 }
  0x10   : > { %228 = sbr.rel (%p225_p9) target bundleno = 974 (0x3ce), region = 36  ;;  %p264_p10 = scmp.lt.s32.totalorder (!%p225_p9), %s1926_s13, 63 }
  0x15   : > { %v310_v0 = vld [vmem:[%s3218_s1 + $0x18] sm:$0xff]  ;;  %v309_v1 = vld [vmem:[%s3218_s1 + $0x10] sm:$0xff]  ;;  %v308_v2 = vld [vmem:[%s3218_s1 + $0x8] sm:$0xff]  ;;  %s3231_s13 = smov (!%p264_p10, %s1926_s13), 63  ;;  %vm328_vm0 = vcmask 261120  }
  0x16   : > { %437 = vmatpush.msra.mxu0 %v310_v0  ;;  %2030 = vmatpush.msra.mxu3 %v310_v0  ;;  %v307_v3 = vld [vmem:[%s3218_s1] sm:$0xff]  ;;  %s1927_s18 = sshll.u32 %s3231_s13, 3  ;;  %v326_v58 = vld [vmem:[%s3219_s2 + $0x78] sm:$0xff]  ;;  %v325_v59 = vld [vmem:[%s3219_s2 + $0x70] sm:$0xff]  ;;  %s3157_s13 = sand.u32 1, %s2233_s22  }
  0x17   : > { %s2349_s26 = scalar_lea.vmem %s3217_s0, %s1927_s18  ;;  %v2423_v34 = vld [vmem:[%s3220_s3] ss:$0 sm:$0xff]  ;;  %735 = vmatpush.msra.mxu1 %v326_v58  ;;  %2034 = vmatpush.msra.mxu2 %v326_v58  ;;  %v324_v60 = vld [vmem:[%s3219_s2 + $0x68] sm:$0xff]  ;;  %v322_v0 = vld [vmem:[%s3219_s2 + $0x58] sm:$0xff]  ;;  %s2584_s28 = scalar_lea.vmem %s3221_s4, %s1927_s18 }
  0x18   : > { %438 = vmatpush.msra.mxu0 %v309_v1  ;;  %2031 = vmatpush.msra.mxu3 %v309_v1  ;;  %v2352_v4 = vld [vmem:[%s2349_s26] sm:$0xff]  ;;  %v293_v5 = vld [vmem:[%s2349_s26 + $0x90] sm:$0xff]  ;;  %v2359_v6 = vld [vmem:[%s2349_s26 + $0x8] sm:$0xff]  ;;  %s2027_s18 = sshll.u32 %s2301_s25, 1  ;;  %s1773_s15 = scalar_lea.sflag [#allocation3], %s3157_s13 }
  0x19   : > { %v294_v7 = vld [vmem:[%s2349_s26 + $0x98] sm:$0xff]  ;;  %v2366_v8 = vld [vmem:[%s2349_s26 + $0x10] sm:$0xff]  ;;  %v295_v9 = vld [vmem:[%s2349_s26 + $0xa0] sm:$0xff]  ;;  %736 = vmatpush.msra.mxu1 %v325_v59  ;;  %2036 = vmatpush.msra.mxu2 %v325_v59  ;;  %s1791_s10 = scalar_lea.hbm %s3222_s5, %s2027_s18 }
  0x1a   : > { %439 = vmatpush.msra.mxu0 %v308_v2  ;;  %2032 = vmatpush.msra.mxu3 %v308_v2  ;;  %v278_v10 = vld [vmem:[%s2349_s26 + $0x18] sm:$0xff]  ;;  %v296_v11 = vld [vmem:[%s2349_s26 + $0xa8] sm:$0xff]  ;;  %v279_v12 = vld [vmem:[%s2349_s26 + $0x20] sm:$0xff]  ;;  %s1795_s14 = sshll.u32 %s1791_s10, 4  ;;  %s1796_s14 = int_to_ptr.hbm [resolvable:$true] %s1795_s14 }
  0x1b   : > { %v297_v13 = vld [vmem:[%s2349_s26 + $0xb0] sm:$0xff]  ;;  %v280_v14 = vld [vmem:[%s2349_s26 + $0x28] sm:$0xff]  ;;  %v298_v15 = vld [vmem:[%s2349_s26 + $0xb8] sm:$0xff]  ;;  %737 = vmatpush.msra.mxu1 %v324_v60  ;;  %2038 = vmatpush.msra.mxu2 %v324_v60  ;;  %s2161_s16 = sshra.s32 %s1796_s14, 4  ;;  %s2162_s16 = int_to_ptr.hbm [resolvable:$true] %s2161_s16 }
  0x1c   : > { %440 = vmatpush.msra.mxu0 %v307_v3  ;;  %2033 = vmatpush.msra.mxu3 %v307_v3  ;;  %v281_v16 = vld [vmem:[%s2349_s26 + $0x30] sm:$0xff]  ;;  %v299_v17 = vld [vmem:[%s2349_s26 + $0xc0] sm:$0xff]  ;;  %v282_v18 = vld [vmem:[%s2349_s26 + $0x38] sm:$0xff]  ;;  %s2163_s17 = scalar_lea.hbm %s2162_s16, 2  ;;  %p2168_p0 = scmp.lt.s32.totalorder %s2162_s16, %s3222_s5 }
  0x1d   : > { %1930 = vmatmul.msk.f32.vlgmr.msra.gmra.mxu0 %vm328_vm0, %v2352_v4  ;;  %1948 = vmatmul.msk.f32.vlgmr.msra.gmra.mxu3 %vm328_vm0, %v293_v5  ;;  %v300_v19 = vld [vmem:[%s2349_s26 + $0xc8] sm:$0xff]  ;;  %v283_v20 = vld [vmem:[%s2349_s26 + $0x40] sm:$0xff]  ;;  %v301_v21 = vld [vmem:[%s2349_s26 + $0xd0] sm:$0xff]  ;;  %p2164_p11 = scmp.ne.s32.totalorder %s2162_s16, %s2163_s17 }
  0x1e   : > { %v284_v22 = vld [vmem:[%s2349_s26 + $0x48] sm:$0xff]  ;;  %v302_v23 = vld [vmem:[%s2349_s26 + $0xd8] sm:$0xff]  ;;  %v285_v24 = vld [vmem:[%s2349_s26 + $0x50] sm:$0xff]  ;;  %2035 = vmatpush.msrb.mxu3 %v326_v58 }
  0x1f   : > { %v303_v25 = vld [vmem:[%s2349_s26 + $0xe0] sm:$0xff]  ;;  %v286_v26 = vld [vmem:[%s2349_s26 + $0x58] sm:$0xff]  ;;  %v304_v27 = vld [vmem:[%s2349_s26 + $0xe8] sm:$0xff]  ;;  %p2165_p12 = pnand %p2164_p11, %p2318_p5 }
  0x20   : > { %v287_v28 = vld [vmem:[%s2349_s26 + $0x60] sm:$0xff]  ;;  %v305_v29 = vld [vmem:[%s2349_s26 + $0xf0] sm:$0xff]  ;;  %v288_v30 = vld [vmem:[%s2349_s26 + $0x68] sm:$0xff]  ;;  %2037 = vmatpush.msrb.mxu3 %v325_v59 }
  0x21   : > { %v306_v31 = vld [vmem:[%s2349_s26 + $0xf8] sm:$0xff]  ;;  %v289_v32 = vld [vmem:[%s2349_s26 + $0x70] sm:$0xff]  ;;  %v291_v36 = vld [vmem:[%s2349_s26 + $0x80] sm:$0xff]  ;;  %p2166_p13 = pneg %p2165_p12 }
  0x22   : > { %v290_v33 = vld [vmem:[%s2349_s26 + $0x78] sm:$0xff]  ;;  %v292_v40 = vld [vmem:[%s2349_s26 + $0x88] sm:$0xff]  ;;  %v323_v61 = vld [vmem:[%s3219_s2 + $0x60] sm:$0xff]  ;;  %2039 = vmatpush.msrb.mxu3 %v324_v60 }
  0x23   : > { %738 = vmatpush.msra.mxu1 %v323_v61  ;;  %2040 = vmatpush.msra.mxu2 %v323_v61  ;;  %v321_v2 = vld [vmem:[%s3219_s2 + $0x50] sm:$0xff]  ;;  %v320_v3 = vld [vmem:[%s3219_s2 + $0x48] sm:$0xff]  ;;  %v319_v5 = vld [vmem:[%s3219_s2 + $0x40] sm:$0xff] }
  0x24   : > { %2041 = vmatpush.msrb.mxu3 %v323_v61 }
  0x25   : > { %1931 = vmatmul.msk.f32.gmra.mxu0 %vm328_vm0, %v2359_v6  ;;  %1949 = vmatmul.msk.f32.gmra.mxu3 %vm328_vm0, %v294_v7 }
  0x26   : > { %739 = vmatpush.msra.mxu1 %v322_v0  ;;  %2042 = vmatpush.msra.mxu2 %v322_v0 }
  0x27   : > { %2043 = vmatpush.msrb.mxu3 %v322_v0 }
  0x28   : > { %740 = vmatpush.msra.mxu1 %v321_v2  ;;  %2044 = vmatpush.msra.mxu2 %v321_v2 }
  0x29   : > { %2045 = vmatpush.msrb.mxu3 %v321_v2 }
  0x2a   : > { %741 = vmatpush.msra.mxu1 %v320_v3  ;;  %2046 = vmatpush.msra.mxu2 %v320_v3 }
  0x2b   : > { %2047 = vmatpush.msrb.mxu3 %v320_v3 }
  0x2c   : > { %742 = vmatpush.msra.mxu1 %v319_v5  ;;  %2048 = vmatpush.msra.mxu2 %v319_v5 }
  0x2d   : > { %1932 = vmatmul.msk.f32.gmra.mxu0 %vm328_vm0, %v2366_v8  ;;  %1950 = vmatmul.msk.f32.gmra.mxu3 %vm328_vm0, %v295_v9 }
  0x2e   : > { %2049 = vmatpush.msrb.mxu3 %v319_v5 }
  0x35   : > { %1933 = vmatmul.msk.f32.gmra.mxu0 %vm328_vm0, %v278_v10  ;;  %1951 = vmatmul.msk.f32.gmra.mxu3 %vm328_vm0, %v296_v11  ;;  %v318_v10 = vld [vmem:[%s3219_s2 + $0x38] sm:$0xff]  ;;  %v317_v11 = vld [vmem:[%s3219_s2 + $0x30] sm:$0xff] }
  0x36   : > { %743 = vmatpush.msra.mxu1 %v318_v10  ;;  %2050 = vmatpush.msra.mxu2 %v318_v10 }
  0x37   : > { %2051 = vmatpush.msrb.mxu3 %v318_v10 }
  0x38   : > { %744 = vmatpush.msra.mxu1 %v317_v11  ;;  %2052 = vmatpush.msra.mxu2 %v317_v11 }
  0x39   : > { %2053 = vmatpush.msrb.mxu3 %v317_v11 }
  0x3d   : > { %1934 = vmatmul.msk.f32.gmra.mxu0 %vm328_vm0, %v279_v12  ;;  %1952 = vmatmul.msk.f32.gmra.mxu3 %vm328_vm0, %v297_v13  ;;  %v316_v13 = vld [vmem:[%s3219_s2 + $0x28] sm:$0xff] }
  0x3e   : > { %745 = vmatpush.msra.mxu1 %v316_v13  ;;  %2054 = vmatpush.msra.mxu2 %v316_v13 }
  0x3f   : > { %2055 = vmatpush.msrb.mxu3 %v316_v13 }
  0x45   : > { %1935 = vmatmul.msk.f32.gmra.mxu0 %vm328_vm0, %v280_v14  ;;  %1953 = vmatmul.msk.f32.gmra.mxu3 %vm328_vm0, %v298_v15  ;;  %v315_v14 = vld [vmem:[%s3219_s2 + $0x20] sm:$0xff] }
  0x46   : > { %746 = vmatpush.msra.mxu1 %v315_v14  ;;  %2056 = vmatpush.msra.mxu2 %v315_v14 }
  0x47   : > { %2057 = vmatpush.msrb.mxu3 %v315_v14 }
  0x4d   : > { %1936 = vmatmul.msk.f32.gmra.mxu0 %vm328_vm0, %v281_v16  ;;  %1954 = vmatmul.msk.f32.gmra.mxu3 %vm328_vm0, %v299_v17  ;;  %v314_v16 = vld [vmem:[%s3219_s2 + $0x18] sm:$0xff]  ;;  %v313_v17 = vld [vmem:[%s3219_s2 + $0x10] sm:$0xff] }
  0x4e   : > { %747 = vmatpush.msra.mxu1 %v314_v16  ;;  %2058 = vmatpush.msra.mxu2 %v314_v16 }
  0x4f   : > { %2059 = vmatpush.msrb.mxu3 %v314_v16 }
  0x50   : > { %748 = vmatpush.msra.mxu1 %v313_v17  ;;  %2060 = vmatpush.msra.mxu2 %v313_v17 }
  0x51   : > { %2061 = vmatpush.msrb.mxu3 %v313_v17 }
  0x55   : > { %1937 = vmatmul.msk.f32.gmra.mxu0 %vm328_vm0, %v282_v18  ;;  %1955 = vmatmul.msk.f32.gmra.mxu3 %vm328_vm0, %v300_v19  ;;  %v312_v18 = vld [vmem:[%s3219_s2 + $0x8] sm:$0xff] }
  0x56   : > { %749 = vmatpush.msra.mxu1 %v312_v18  ;;  %2062 = vmatpush.msra.mxu2 %v312_v18 }
  0x57   : > { %2063 = vmatpush.msrb.mxu3 %v312_v18 }
  0x5d   : > { %1938 = vmatmul.msk.f32.gmra.mxu0 %vm328_vm0, %v283_v20  ;;  %1956 = vmatmul.msk.f32.gmra.mxu3 %vm328_vm0, %v301_v21 }
  0x65   : > { %1939 = vmatmul.msk.f32.gmra.mxu0 %vm328_vm0, %v284_v22  ;;  %1957 = vmatmul.msk.f32.gmra.mxu3 %vm328_vm0, %v302_v23  ;;  %v311_v22 = vld [vmem:[%s3219_s2] sm:$0xff] }
  0x66   : > { %750 = vmatpush.msra.mxu1 %v311_v22  ;;  %2064 = vmatpush.msra.mxu2 %v311_v22 }
  0x67   : > { %2065 = vmatpush.msrb.mxu3 %v311_v22 }
  0x6d   : > { %1940 = vmatmul.msk.f32.gmra.mxu0 %vm328_vm0, %v285_v24  ;;  %1958 = vmatmul.msk.f32.gmra.mxu3 %vm328_vm0, %v303_v25 }
  0x75   : > { %1941 = vmatmul.msk.f32.gmra.mxu0 %vm328_vm0, %v286_v26  ;;  %1959 = vmatmul.msk.f32.gmra.mxu3 %vm328_vm0, %v304_v27 }
  0x7d   : > { %1942 = vmatmul.msk.f32.gmra.mxu0 %vm328_vm0, %v287_v28  ;;  %1960 = vmatmul.msk.f32.gmra.mxu3 %vm328_vm0, %v305_v29 }
  0x85   : > { %1943 = vmatmul.msk.f32.gmra.mxu0 %vm328_vm0, %v288_v30  ;;  %1961 = vmatmul.msk.f32.gmra.mxu3 %vm328_vm0, %v306_v31  ;;  %v637_v30 = vlaneseq }
  0x8d   : > { %1944 = vmatmul.msk.f32.gmra.mxu0 %vm328_vm0, %v289_v32  ;;  %v2524_v32 = vand.u32 127, %v637_v30 }
  0x95   : > { %1945 = vmatmul.msk.f32.gmra.mxu0 %vm328_vm0, %v290_v33 }
  0x9a   : > { %v442_v35 = vpop.f32.mrf.mxu0 }
  0x9b   : > { %v541_v37 = vsub.f32 %v2423_v34, %v442_v35 }
  0x9d   : > { %1946 = vmatmul.msk.f32.gmra.mxu0 %vm328_vm0, %v291_v36  ;;  %573 = vmin.index.xlane.f32.xlu0 %v541_v37 }
  0xa0   : > { %v496_v38 = vpop.f32.mrf.mxu3 }
  0xa1   : > { %v559_v53 = vsub.f32 %v2423_v34, %v496_v38 }
  0xa2   : > { %v445_v39 = vpop.f32.mrf.mxu0 }
  0xa3   : > { %v542_v41 = vsub.f32 %v2423_v34, %v445_v39 }
  0xa5   : > { %1947 = vmatmul.msk.f32.gmra.mxu0 %vm328_vm0, %v292_v40  ;;  %575 = vmin.index.xlane.f32.xlu0 %v542_v41 }
  0xa8   : > { %v2431_v42 = vpop.f32.mrf.mxu3 }
  0xaa   : > { %v448_v43 = vpop.f32.mrf.mxu0 }
  0xab   : > { %v543_v44 = vsub.f32 %v2423_v34, %v448_v43 }
  0xad   : > { %577 = vmin.index.xlane.f32.xlu1 %v543_v44 }
  0xb0   : > { %v2434_v45 = vpop.f32.mrf.mxu3 }
  0xb2   : > { %v451_v46 = vpop.f32.mrf.mxu0 }
  0xb3   : > { %v544_v47 = vsub.f32 %v2423_v34, %v451_v46  ;;  %v2243_v46 = vmov 1.0  }
  0xb5   : > { %579 = vmin.index.xlane.f32.xlu1 %v544_v47 }
  0xb8   : > { %v505_v48 = vpop.f32.mrf.mxu3 }
  0xb9   : > { %v562_v7 = vsub.f32 %v2423_v34, %v505_v48 }
  0xba   : > { %v2437_v49 = vpop.f32.mrf.mxu0 }
  0xbb   : > { %v545_v58 = vsub.f32 %v2423_v34, %v2437_v49 }
  0xc0   : > { %v2439_v50 = vpop.f32.mrf.mxu3 }
  0xc2   : > { %v457_v51 = vpop.f32.mrf.mxu0 }
  0xc3   : > { %v546_v52 = vsub.f32 %v2423_v34, %v457_v51 }
  0xc5   : > { %583 = vmin.index.xlane.f32.xlu1 %v546_v52 }
  0xc8   : > { %v2443_v54 = vpop.f32.mrf.mxu3 }
  0xca   : > { %v2445_v55 = vpop.f32.mrf.mxu0 }
  0xcb   : > { %v547_v10 = vsub.f32 %v2423_v34, %v2445_v55  ;;  %v560_v55 = vsub.f32 %v2423_v34, %v2431_v42  ;;  %v561_v42 = vsub.f32 %v2423_v34, %v2434_v45 }
  0xcd   : > { %609 = vmin.index.xlane.f32.xlu1 %v559_v53 }
  0xd0   : > { %v2447_v56 = vpop.f32.mrf.mxu3 }
  0xd1   : > { %v565_v24 = vsub.f32 %v2423_v34, %v2447_v56 }
  0xd2   : > { %v2449_v57 = vpop.f32.mrf.mxu0 }
  0xd3   : > { %v548_v16 = vsub.f32 %v2423_v34, %v2449_v57 }
  0xd8   : > { %v2463_v63 = vpop.f32.mrf.mxu3 }
  0xda   : > { %v466_v62 = vpop.f32.mrf.mxu0 }
  0xdb   : > { %v549_v1 = vsub.f32 %v2423_v34, %v466_v62 }
  0xdd   : > { %589 = vmin.index.xlane.f32.xlu1 %v549_v1 }
  0xe0   : > { %v2487_v12 = vpop.f32.mrf.mxu3 }
  0xe2   : > { %v2479_v9 = vpop.f32.mrf.mxu0 }
  0xe5   : > { %615 = vmin.index.xlane.f32.xlu1 %v562_v7 }
  0xe8   : > { %v2506_v19 = vpop.f32.mrf.mxu3 }
  0xea   : > { %v2495_v15 = vpop.f32.mrf.mxu0 }
  0xf0   : > { %v526_v23 = vpop.f32.mrf.mxu3 }
  0xf1   : > { %v569_v33 = vsub.f32 %v2423_v34, %v526_v23 }
  0xf2   : > { %v475_v20 = vpop.f32.mrf.mxu0 }
  0xf3   : > { %v552_v21 = vsub.f32 %v2423_v34, %v475_v20 }
  0xf5   : > { %595 = vmin.index.xlane.f32.xlu1 %v552_v21  ;;  %v2244_v21 = vmov 0  }
  0xf6   : > { %2116 = vset.pattern.permute.xlu1 %v2244_v21  ;;  %2115 = vset.pattern.permute.xlu0 %v2244_v21 }
  0xf7   : > { %2114 = vset.pattern.permute.xlu2 %v2244_v21 }
  0xf8   : > { %v2518_v27 = vpop.f32.mrf.mxu3 }
  0xfa   : > { %v2514_v25 = vpop.f32.mrf.mxu0 }
  0xfd   : > { %621 = vmin.index.xlane.f32.xlu1 %v565_v24 }
 0x100   : > { %v2521_v31 = vpop.f32.mrf.mxu3 }
 0x102   : > { %v2516_v26 = vpop.f32.mrf.mxu0 }
 0x108   : > { %v535_v51 = vpop.f32.mrf.mxu3 }
 0x109   : > { %v572_v53 = vsub.f32 %v2423_v34, %v535_v51  ;;  %v571_v51 = vsub.f32 %v2423_v34, %v2521_v31 }
 0x10a   : > { %v484_v28 = vpop.f32.mrf.mxu0 }
 0x10b   : > { %v555_v29 = vsub.f32 %v2423_v34, %v484_v28 }
 0x10d   : > { %601 = vmin.index.xlane.f32.xlu1 %v555_v29  ;;  %v550_v29 = vsub.f32 %v2423_v34, %v2479_v9 }
 0x110   : > { %v574_v35 = vpop.xlane.xlu0 %573 }
 0x111   : > { %v880_v36 = vperm.slane %v574_v35, 0  ;;  %v881_v37 = vperm.slane %v574_v35, 1  ;;  %v882_v38 = vperm.slane %v574_v35, 2  ;;  %v883_v39 = vperm.slane %v574_v35, 3 }
 0x112   : > { %v487_v40 = vpop.f32.mrf.mxu0  ;;  %v884_v41 = vperm.slane %v574_v35, 4  ;;  %vm639_vm1 = vcmp.eq.s32.totalorder %v2524_v32, %v574_v35  ;;  %v885_v44 = vperm.slane %v574_v35, 5  ;;  %v886_v47 = vperm.slane %v574_v35, 6 }
 0x113   : > { %1136 = vst [vmem:[#allocation1] ss:$9 sm:$0xff] %v880_v36  ;;  %v556_v43 = vsub.f32 %v2423_v34, %v487_v40  ;;  %1994 = vmatmul.msk.f32.vlgmr.msra.gmra.mxu1 %vm639_vm1, %v2243_v46  ;;  %v887_v48 = vperm.slane %v574_v35, 7  ;;  %v563_v35 = vsub.f32 %v2423_v34, %v2439_v50  ;;  %v551_v36 = vsub.f32 %v2423_v34, %v2495_v15 }
 0x114   : > { %1138 = vst [vmem:[#allocation1 + $0x1] ss:$9 sm:$0xff] %v881_v37  ;;  %v553_v15 = vsub.f32 %v2423_v34, %v2514_v25  ;;  %v568_v25 = vsub.f32 %v2423_v34, %v2506_v19 }
 0x115   : > { %1140 = vst [vmem:[#allocation1 + $0x2] ss:$9 sm:$0xff] %v882_v38  ;;  %629 = vmin.index.xlane.f32.xlu1 %v569_v33  ;;  %603 = vmin.index.xlane.f32.xlu2 %v556_v43 }
 0x116   : > { %1142 = vst [vmem:[#allocation1 + $0x3] ss:$9 sm:$0xff] %v883_v39 }
 0x117   : > { %1144 = vst [vmem:[#allocation1 + $0x4] ss:$9 sm:$0xff] %v884_v41  ;;  %v564_v41 = vsub.f32 %v2423_v34, %v2443_v54  ;;  %v554_v54 = vsub.f32 %v2423_v34, %v2516_v26 }
 0x118   : > { %1146 = vst [vmem:[#allocation1 + $0x5] ss:$9 sm:$0xff] %v885_v44  ;;  %v576_v52 = vpop.xlane.xlu0 %575 }
 0x119   : > { %1148 = vst [vmem:[#allocation1 + $0x6] ss:$9 sm:$0xff] %v886_v47  ;;  %vm640_vm2 = vcmp.eq.s32.totalorder %v2524_v32, %v576_v52  ;;  %v888_v60 = vperm.slane %v576_v52, 0  ;;  %v889_v61 = vperm.slane %v576_v52, 1  ;;  %v890_v62 = vperm.slane %v576_v52, 2 }
 0x11a   : > { %1150 = vst [vmem:[#allocation1 + $0x7] ss:$9 sm:$0xff] %v887_v48  ;;  %v490_v56 = vpop.f32.mrf.mxu0  ;;  %v891_v2 = vperm.slane %v576_v52, 3  ;;  %v892_v3 = vperm.slane %v576_v52, 4  ;;  %v893_v49 = vperm.slane %v576_v52, 5  ;;  %v894_v11 = vperm.slane %v576_v52, 6 }
 0x11b   : > { %v557_v59 = vsub.f32 %v2423_v34, %v490_v56  ;;  %1995 = vmatmul.msk.f32.gmra.mxu1 %vm640_vm2, %v2243_v46  ;;  %v895_v13 = vperm.slane %v576_v52, 7  ;;  %v566_v47 = vsub.f32 %v2423_v34, %v2463_v63  ;;  %v567_v48 = vsub.f32 %v2423_v34, %v2487_v12 }
 0x11c   : > { %v570_v63 = vsub.f32 %v2423_v34, %v2518_v27 }
 0x11d   : > { %635 = vmin.index.xlane.f32.xlu1 %v572_v53  ;;  %581 = vmin.index.xlane.f32.xlu2 %v545_v58 }
 0x11e   : > { %605 = vmin.index.xlane.f32.xlu0 %v557_v59 }
 0x120   : > { %v578_v0 = vpop.xlane.xlu1 %577 }
 0x121   : > { %v2536_v1 = vld [vmem:[#allocation1] sm:$0xff]  ;;  %vm641_vm3 = vcmp.eq.s32.totalorder %v2524_v32, %v578_v0  ;;  %v896_v17 = vperm.slane %v578_v0, 0  ;;  %v897_v18 = vperm.slane %v578_v0, 1  ;;  %v898_v20 = vperm.slane %v578_v0, 2 }
 0x122   : > { %1152 = vst [vmem:[#allocation1] ss:$9 sm:$0xff] %v888_v60  ;;  %v493_v5 = vpop.f32.mrf.mxu0  ;;  %v899_v23 = vperm.slane %v578_v0, 3  ;;  %v900_v24 = vperm.slane %v578_v0, 4  ;;  %v901_v57 = vperm.slane %v578_v0, 5  ;;  %v902_v28 = vperm.slane %v578_v0, 6 }
 0x123   : > { %1153 = vst [vmem:[#allocation1 + $0x1] ss:$9 sm:$0xff] %v889_v61  ;;  %v558_v7 = vsub.f32 %v2423_v34, %v493_v5  ;;  %1996 = vmatmul.msk.f32.gmra.mxu1 %vm641_vm3, %v2243_v46  ;;  %v903_v33 = vperm.slane %v578_v0, 7 }
 0x124   : > { %1154 = vst [vmem:[#allocation1 + $0x2] ss:$9 sm:$0xff] %v890_v62 }
 0x125   : > { %1155 = vst [vmem:[#allocation1 + $0x3] ss:$9 sm:$0xff] %v891_v2  ;;  %607 = vmin.index.xlane.f32.xlu2 %v558_v7 }
 0x126   : > { %1156 = vst [vmem:[#allocation1 + $0x4] ss:$9 sm:$0xff] %v892_v3  ;;  %585 = vmin.index.xlane.f32.xlu0 %v547_v10 }
 0x127   : > { %1157 = vst [vmem:[#allocation1 + $0x5] ss:$9 sm:$0xff] %v893_v49 }
 0x128   : > { %1158 = vst [vmem:[#allocation1 + $0x6] ss:$9 sm:$0xff] %v894_v11  ;;  %v580_v14 = vpop.xlane.xlu1 %579 }
 0x129   : > { %1159 = vst [vmem:[#allocation1 + $0x7] ss:$9 sm:$0xff] %v895_v13  ;;  %vm642_vm4 = vcmp.eq.s32.totalorder %v2524_v32, %v580_v14  ;;  %v904_v45 = vperm.slane %v580_v14, 0  ;;  %v905_v37 = vperm.slane %v580_v14, 1  ;;  %v906_v38 = vperm.slane %v580_v14, 2 }
 0x12a   : > { %v907_v39 = vperm.slane %v580_v14, 3  ;;  %v908_v40 = vperm.slane %v580_v14, 4  ;;  %v909_v43 = vperm.slane %v580_v14, 5  ;;  %v910_v44 = vperm.slane %v580_v14, 6 }
 0x12b   : > { %1997 = vmatmul.msk.f32.gmra.mxu1 %vm642_vm4, %v2243_v46  ;;  %v911_v50 = vperm.slane %v580_v14, 7 }
 0x12d   : > { %587 = vmin.index.xlane.f32.xlu2 %v548_v16 }
 0x12e   : > { %611 = vmin.index.xlane.f32.xlu0 %v560_v55 }
 0x130   : > { %v1160_v22 = vld [vmem:[#allocation1] sm:$0xff] }
 0x131   : > { %1161 = vst [vmem:[#allocation1] ss:$9 sm:$0xff] %v896_v17 }
 0x132   : > { %1162 = vst [vmem:[#allocation1 + $0x1] ss:$9 sm:$0xff] %v897_v18 }
 0x133   : > { %1163 = vst [vmem:[#allocation1 + $0x2] ss:$9 sm:$0xff] %v898_v20 }
 0x134   : > { %1164 = vst [vmem:[#allocation1 + $0x3] ss:$9 sm:$0xff] %v899_v23 }
 0x135   : > { %1165 = vst [vmem:[#allocation1 + $0x4] ss:$9 sm:$0xff] %v900_v24  ;;  %613 = vmin.index.xlane.f32.xlu2 %v561_v42 }
 0x136   : > { %1166 = vst [vmem:[#allocation1 + $0x5] ss:$9 sm:$0xff] %v901_v57  ;;  %591 = vmin.index.xlane.f32.xlu0 %v550_v29 }
 0x137   : > { %1167 = vst [vmem:[#allocation1 + $0x6] ss:$9 sm:$0xff] %v902_v28 }
 0x138   : > { %1168 = vst [vmem:[#allocation1 + $0x7] ss:$9 sm:$0xff] %v903_v33 }
 0x13d   : > { %593 = vmin.index.xlane.f32.xlu2 %v551_v36 }
 0x13e   : > { %617 = vmin.index.xlane.f32.xlu0 %v563_v35 }
 0x13f   : > { %v1169_v9 = vld [vmem:[#allocation1] sm:$0xff] }
 0x140   : > { %1170 = vst [vmem:[#allocation1] ss:$9 sm:$0xff] %v904_v45  ;;  %1438 = vperm.xlu1 %2116, %v1169_v9  }
 0x141   : > { %1171 = vst [vmem:[#allocation1 + $0x1] ss:$9 sm:$0xff] %v905_v37 }
 0x142   : > { %1172 = vst [vmem:[#allocation1 + $0x2] ss:$9 sm:$0xff] %v906_v38 }
 0x143   : > { %1173 = vst [vmem:[#allocation1 + $0x3] ss:$9 sm:$0xff] %v907_v39 }
 0x144   : > { %1174 = vst [vmem:[#allocation1 + $0x4] ss:$9 sm:$0xff] %v908_v40 }
 0x145   : > { %1175 = vst [vmem:[#allocation1 + $0x5] ss:$9 sm:$0xff] %v909_v43  ;;  %619 = vmin.index.xlane.f32.xlu2 %v564_v41 }
 0x146   : > { %1176 = vst [vmem:[#allocation1 + $0x6] ss:$9 sm:$0xff] %v910_v44  ;;  %597 = vmin.index.xlane.f32.xlu0 %v553_v15 }
 0x147   : > { %1177 = vst [vmem:[#allocation1 + $0x7] ss:$9 sm:$0xff] %v911_v50 }
 0x14d   : > { %599 = vmin.index.xlane.f32.xlu2 %v554_v54 }
 0x14e   : > { %623 = vmin.index.xlane.f32.xlu0 %v566_v47  ;;  %v1178_v26 = vld [vmem:[#allocation1] sm:$0xff] }
 0x155   : > { %625 = vmin.index.xlane.f32.xlu2 %v567_v48 }
 0x156   : > { %627 = vmin.index.xlane.f32.xlu0 %v568_v25 }
 0x15d   : > { %633 = vmin.index.xlane.f32.xlu2 %v571_v51 }
 0x15e   : > { %631 = vmin.index.xlane.f32.xlu0 %v570_v63 }
 0x172   : > { %1435 = vperm.xlu0 %2115, %v1160_v22  }
 0x175   : > { %1432 = vperm.xlu2 %2114, %v2536_v1   ;;  %v584_v1 = vpop.xlane.xlu1 %583 }
 0x176   : > { %vm644_vm8 = vcmp.eq.s32.totalorder %v2524_v32, %v584_v1  ;;  %v921_v13 = vperm.slane %v584_v1, 1  ;;  %v922_v55 = vperm.slane %v584_v1, 2  ;;  %v923_v18 = vperm.slane %v584_v1, 3 }
 0x177   : > { %v924_v20 = vperm.slane %v584_v1, 4  ;;  %v925_v23 = vperm.slane %v584_v1, 5  ;;  %v926_v24 = vperm.slane %v584_v1, 6  ;;  %v927_v57 = vperm.slane %v584_v1, 7 }
 0x17d   : > { %1441 = vperm.xlu2 %2114, %v1178_v26   ;;  %v2609_v21 = vpop.xlane.xlu1 %609 }
 0x17e   : > { %vm657_vm11 = vcmp.eq.s32.totalorder %v2524_v32, %v2609_v21 }
 0x185   : > { %v590_v38 = vpop.xlane.xlu1 %589 }
 0x186   : > { %vm647_vm14 = vcmp.eq.s32.totalorder %v2524_v32, %v590_v38 }
 0x188   : > { %v2574_v52 = vpop.xlane.xlu2 %603 }
 0x189   : > { %vm654_vm5 = vcmp.eq.s32.totalorder %v2524_v32, %v2574_v52 }
 0x18a   : > { %2009 = vmatmul.msk.f32.vlgmr.msra.gmra.mxu2 %vm654_vm5, %v2243_v46 }
 0x190   : > { %v582_v34 = vpop.xlane.xlu2 %581  ;;  %v752_v12 = vpop.f32.mrf.mxu1 }
 0x191   : > { %v912_v19 = vperm.slane %v582_v34, 0  ;;  %v913_v27 = vperm.slane %v582_v34, 1  ;;  %v914_v31 = vperm.slane %v582_v34, 2  ;;  %848 = vst.msk [vmem:[%s2584_s28] sm:$0xff] %vm328_vm0, %v752_v12  ;;  %v915_v53 = vperm.slane %v582_v34, 3  ;;  %v2588_v56 = vpop.xlane.xlu0 %605 }
 0x192   : > { %v916_v58 = vperm.slane %v582_v34, 4  ;;  %v917_v59 = vperm.slane %v582_v34, 5  ;;  %v918_v60 = vperm.slane %v582_v34, 6  ;;  %vm643_vm6 = vcmp.eq.s32.totalorder %v2524_v32, %v582_v34 }
 0x193   : > { %1179 = vst [vmem:[#allocation1] ss:$9 sm:$0xff] %v912_v19  ;;  %vm655_vm7 = vcmp.eq.s32.totalorder %v2524_v32, %v2588_v56  ;;  %v1627_v61 = vsub.f32 %v752_v12, %v2352_v4  ;;  %v919_v62 = vperm.slane %v582_v34, 7  ;;  %1998 = vmatmul.msk.f32.gmra.mxu1 %vm643_vm6, %v2243_v46  ;;  %v2642_v12 = vpop.xlane.xlu1 %615  ;;  %v944_v19 = vperm.slane %v590_v38, 0 }
 0x194   : > { %1180 = vst [vmem:[#allocation1 + $0x1] ss:$9 sm:$0xff] %v913_v27  ;;  %2010 = vmatmul.msk.f32.gmra.mxu2 %vm655_vm7, %v2243_v46  ;;  %vm660_vm2 = vcmp.eq.s32.totalorder %v2524_v32, %v2642_v12  ;;  %v945_v27 = vperm.slane %v590_v38, 1 }
 0x195   : > { %1181 = vst [vmem:[#allocation1 + $0x2] ss:$9 sm:$0xff] %v914_v31  ;;  %v1659_v2 = vmul.f32 %v1627_v61, %v1627_v61  ;;  %v950_v61 = vperm.slane %v590_v38, 6 }
 0x196   : > { %1182 = vst [vmem:[#allocation1 + $0x3] ss:$9 sm:$0xff] %v915_v53  ;;  %v946_v53 = vperm.slane %v590_v38, 2 }
 0x197   : > { %1183 = vst [vmem:[#allocation1 + $0x4] ss:$9 sm:$0xff] %v916_v58  ;;  %v1691_v49 = vsel %vm328_vm0, %v1659_v2, 0.0  ;;  %v947_v58 = vperm.slane %v590_v38, 3 }
 0x198   : > { %1184 = vst [vmem:[#allocation1 + $0x5] ss:$9 sm:$0xff] %v917_v59  ;;  %v755_v0 = vpop.f32.mrf.mxu1  ;;  %v2597_v5 = vpop.xlane.xlu2 %607  ;;  %v948_v59 = vperm.slane %v590_v38, 4 }
 0x199   : > { %1185 = vst [vmem:[#allocation1 + $0x6] ss:$9 sm:$0xff] %v918_v60  ;;  %v1628_v3 = vsub.f32 %v755_v0, %v2359_v6  ;;  %vm656_vm9 = vcmp.eq.s32.totalorder %v2524_v32, %v2597_v5  ;;  %v920_v6 = vperm.slane %v584_v1, 0  ;;  %v586_v11 = vpop.xlane.xlu0 %585  ;;  %v949_v60 = vperm.slane %v590_v38, 5 }
 0x19a   : > { %1186 = vst [vmem:[#allocation1 + $0x7] ss:$9 sm:$0xff] %v919_v62  ;;  %vm645_vm10 = vcmp.eq.s32.totalorder %v2524_v32, %v586_v11  ;;  %v928_v35 = vperm.slane %v586_v11, 0  ;;  %v929_v45 = vperm.slane %v586_v11, 1  ;;  %v930_v37 = vperm.slane %v586_v11, 2 }
 0x19b   : > { %849 = vst.msk [vmem:[%s2584_s28 + $0x8] sm:$0xff] %vm328_vm0, %v755_v0  ;;  %v1660_v4 = vmul.f32 %v1628_v3, %v1628_v3  ;;  %1999 = vmatmul.msk.f32.gmra.mxu1 %vm644_vm8, %v2243_v46  ;;  %v931_v9 = vperm.slane %v586_v11, 3  ;;  %v932_v39 = vperm.slane %v586_v11, 4  ;;  %v933_v40 = vperm.slane %v586_v11, 5 }
 0x19c   : > { %2011 = vmatmul.msk.f32.gmra.mxu2 %vm656_vm9, %v2243_v46  ;;  %v934_v41 = vperm.slane %v586_v11, 6  ;;  %v935_v43 = vperm.slane %v586_v11, 7  ;;  %v951_v62 = vperm.slane %v590_v38, 7 }
 0x19d   : > { %v1692_v7 = vsel %vm328_vm0, %v1660_v4, 0.0 }
 0x19e   : > { %v1693_v10 = vadd.f32 %v1692_v7, %v1691_v49 }
 0x1a0   : > { %v758_v16 = vpop.f32.mrf.mxu1  ;;  %v588_v28 = vpop.xlane.xlu2 %587 }
 0x1a1   : > { %v1187_v14 = vld [vmem:[#allocation1] sm:$0xff]  ;;  %v1629_v17 = vsub.f32 %v758_v16, %v2366_v8  ;;  %850 = vst.msk [vmem:[%s2584_s28 + $0x10] sm:$0xff] %vm328_vm0, %v758_v16  ;;  %v2621_v29 = vpop.xlane.xlu0 %611  ;;  %vm646_vm12 = vcmp.eq.s32.totalorder %v2524_v32, %v588_v28  ;;  %v936_v44 = vperm.slane %v588_v28, 0  ;;  %v937_v47 = vperm.slane %v588_v28, 1 }
 0x1a2   : > { %1188 = vst [vmem:[#allocation1] ss:$9 sm:$0xff] %v920_v6  ;;  %1444 = vperm.xlu2 %2114, %v1187_v14   ;;  %vm658_vm13 = vcmp.eq.s32.totalorder %v2524_v32, %v2621_v29  ;;  %v938_v54 = vperm.slane %v588_v28, 2  ;;  %v939_v48 = vperm.slane %v588_v28, 3  ;;  %v940_v25 = vperm.slane %v588_v28, 4 }
 0x1a3   : > { %1189 = vst [vmem:[#allocation1 + $0x1] ss:$9 sm:$0xff] %v921_v13  ;;  %v1661_v22 = vmul.f32 %v1629_v17, %v1629_v17  ;;  %2000 = vmatmul.msk.f32.gmra.mxu1 %vm645_vm10, %v2243_v46  ;;  %v941_v51 = vperm.slane %v588_v28, 5  ;;  %v942_v63 = vperm.slane %v588_v28, 6  ;;  %v943_v26 = vperm.slane %v588_v28, 7 }
 0x1a4   : > { %1190 = vst [vmem:[#allocation1 + $0x2] ss:$9 sm:$0xff] %v922_v55  ;;  %2012 = vmatmul.msk.f32.gmra.mxu2 %vm657_vm11, %v2243_v46 }
 0x1a5   : > { %1191 = vst [vmem:[#allocation1 + $0x3] ss:$9 sm:$0xff] %v923_v18  ;;  %v1694_v8 = vsel %vm328_vm0, %v1661_v22, 0.0 }
 0x1a6   : > { %1192 = vst [vmem:[#allocation1 + $0x4] ss:$9 sm:$0xff] %v924_v20  ;;  %v2617_v42 = vadd.f32 %v1694_v8, %v1693_v10 }
 0x1a7   : > { %1193 = vst [vmem:[#allocation1 + $0x5] ss:$9 sm:$0xff] %v925_v23 }
 0x1a8   : > { %1194 = vst [vmem:[#allocation1 + $0x6] ss:$9 sm:$0xff] %v926_v24  ;;  %v2623_v33 = vpop.f32.mrf.mxu1  ;;  %v2635_v50 = vpop.xlane.xlu2 %613 }
 0x1a9   : > { %1195 = vst [vmem:[#allocation1 + $0x7] ss:$9 sm:$0xff] %v927_v57  ;;  %vm659_vm15 = vcmp.eq.s32.totalorder %v2524_v32, %v2635_v50  ;;  %v592_v34 = vpop.xlane.xlu0 %591  ;;  %v2647_v24 = vpop.xlane.xlu1 %595 }
 0x1aa   : > { %851 = vst.msk [vmem:[%s2584_s28 + $0x18] sm:$0xff] %vm328_vm0, %v2623_v33  ;;  %vm648_vm1 = vcmp.eq.s32.totalorder %v2524_v32, %v592_v34  ;;  %v952_v0 = vperm.slane %v592_v34, 0  ;;  %v953_v2 = vperm.slane %v592_v34, 1  ;;  %v954_v3 = vperm.slane %v592_v34, 2 }
 0x1ab   : > { %2001 = vmatmul.msk.f32.gmra.mxu1 %vm646_vm12, %v2243_v46  ;;  %v955_v4 = vperm.slane %v592_v34, 3  ;;  %v956_v49 = vperm.slane %v592_v34, 4  ;;  %v957_v7 = vperm.slane %v592_v34, 5  ;;  %v958_v10 = vperm.slane %v592_v34, 6 }
 0x1ac   : > { %2013 = vmatmul.msk.f32.gmra.mxu2 %vm658_vm13, %v2243_v46  ;;  %v959_v6 = vperm.slane %v592_v34, 7  ;;  %v968_v8 = vperm.slane %v2647_v24, 0  ;;  %v969_v57 = vperm.slane %v2647_v24, 1  ;;  %v973_v38 = vperm.slane %v2647_v24, 5 }
 0x1ad   : > { %vm650_vm5 = vcmp.eq.s32.totalorder %v2524_v32, %v2647_v24 }
 0x1b0   : > { %v1196_v36 = vld [vmem:[#allocation1] sm:$0xff]  ;;  %v594_v11 = vpop.xlane.xlu2 %593 }
 0x1b1   : > { %1197 = vst [vmem:[#allocation1] ss:$9 sm:$0xff] %v928_v35  ;;  %1447 = vperm.xlu1 %2116, %v1196_v36   ;;  %v960_v13 = vperm.slane %v594_v11, 0  ;;  %v961_v16 = vperm.slane %v594_v11, 1  ;;  %v962_v55 = vperm.slane %v594_v11, 2  ;;  %v963_v17 = vperm.slane %v594_v11, 3  ;;  %v2652_v36 = vpop.xlane.xlu0 %617 }
 0x1b2   : > { %1198 = vst [vmem:[#allocation1 + $0x1] ss:$9 sm:$0xff] %v929_v45  ;;  %v964_v18 = vperm.slane %v594_v11, 4  ;;  %v965_v20 = vperm.slane %v594_v11, 5  ;;  %v966_v22 = vperm.slane %v594_v11, 6  ;;  %v967_v23 = vperm.slane %v594_v11, 7 }
 0x1b3   : > { %1199 = vst [vmem:[#allocation1 + $0x2] ss:$9 sm:$0xff] %v930_v37  ;;  %2002 = vmatmul.msk.f32.gmra.mxu1 %vm647_vm14, %v2243_v46  ;;  %v970_v35 = vperm.slane %v2647_v24, 2  ;;  %v971_v45 = vperm.slane %v2647_v24, 3  ;;  %v972_v37 = vperm.slane %v2647_v24, 4  ;;  %vm649_vm3 = vcmp.eq.s32.totalorder %v2524_v32, %v594_v11 }
 0x1b4   : > { %1200 = vst [vmem:[#allocation1 + $0x3] ss:$9 sm:$0xff] %v931_v9  ;;  %2014 = vmatmul.msk.f32.gmra.mxu2 %vm659_vm15, %v2243_v46  ;;  %v974_v9 = vperm.slane %v2647_v24, 6  ;;  %vm661_vm4 = vcmp.eq.s32.totalorder %v2524_v32, %v2652_v36  ;;  %vm1530_vm14 = vcmask 130112   ;;  %vm1534_vm15 = vcmask 195712  }
 0x1b5   : > { %1201 = vst [vmem:[#allocation1 + $0x4] ss:$9 sm:$0xff] %v932_v39  ;;  %v975_v39 = vperm.slane %v2647_v24, 7  ;;  %v1008_v24 = vperm.slane %v2588_v56, 0 }
 0x1b6   : > { %1202 = vst [vmem:[#allocation1 + $0x5] ss:$9 sm:$0xff] %v933_v40 }
 0x1b7   : > { %1203 = vst [vmem:[#allocation1 + $0x6] ss:$9 sm:$0xff] %v934_v41 }
 0x1b8   : > { %1204 = vst [vmem:[#allocation1 + $0x7] ss:$9 sm:$0xff] %v935_v43 }
 0x1b9   : > { %v2659_v40 = vpop.xlane.xlu0 %597 }
 0x1ba   : > { %v976_v41 = vperm.slane %v2659_v40, 0  ;;  %vm651_vm7 = vcmp.eq.s32.totalorder %v2524_v32, %v2659_v40 }
 0x1bb   : > { %2003 = vmatmul.msk.f32.gmra.mxu1 %vm648_vm1, %v2243_v46 }
 0x1bc   : > { %2015 = vmatmul.msk.f32.gmra.mxu2 %vm660_vm2, %v2243_v46  ;;  %vm1538_vm2 = vcmask 261312  }
 0x1bf   : > { %v1205_v15 = vld [vmem:[#allocation1] sm:$0xff] }
 0x1c0   : > { %1206 = vst [vmem:[#allocation1] ss:$9 sm:$0xff] %v936_v44  ;;  %1450 = vperm.xlu2 %2114, %v1205_v15   ;;  %v977_v44 = vperm.slane %v2659_v40, 1  ;;  %v978_v15 = vperm.slane %v2659_v40, 2 }
 0x1c1   : > { %1207 = vst [vmem:[#allocation1 + $0x1] ss:$9 sm:$0xff] %v937_v47  ;;  %v2666_v47 = vpop.xlane.xlu2 %619 }
 0x1c2   : > { %1208 = vst [vmem:[#allocation1 + $0x2] ss:$9 sm:$0xff] %v938_v54  ;;  %v979_v54 = vperm.slane %v2659_v40, 3  ;;  %vm662_vm6 = vcmp.eq.s32.totalorder %v2524_v32, %v2666_v47 }
 0x1c3   : > { %1209 = vst [vmem:[#allocation1 + $0x3] ss:$9 sm:$0xff] %v939_v48  ;;  %v980_v48 = vperm.slane %v2659_v40, 4  ;;  %2004 = vmatmul.msk.f32.gmra.mxu1 %vm649_vm3, %v2243_v46 }
 0x1c4   : > { %1210 = vst [vmem:[#allocation1 + $0x4] ss:$9 sm:$0xff] %v940_v25  ;;  %v981_v25 = vperm.slane %v2659_v40, 5  ;;  %2016 = vmatmul.msk.f32.gmra.mxu2 %vm661_vm4, %v2243_v46  ;;  %vm1542_vm4 = vcmask 326912  }
 0x1c5   : > { %1211 = vst [vmem:[#allocation1 + $0x5] ss:$9 sm:$0xff] %v941_v51  ;;  %v982_v51 = vperm.slane %v2659_v40, 6 }
 0x1c6   : > { %1212 = vst [vmem:[#allocation1 + $0x6] ss:$9 sm:$0xff] %v942_v63  ;;  %v983_v63 = vperm.slane %v2659_v40, 7 }
 0x1c7   : > { %1213 = vst [vmem:[#allocation1 + $0x7] ss:$9 sm:$0xff] %v943_v26 }
 0x1c9   : > { %v2673_v26 = vpop.xlane.xlu2 %599 }
 0x1ca   : > { %v984_v34 = vperm.slane %v2673_v26, 0  ;;  %vm652_vm8 = vcmp.eq.s32.totalorder %v2524_v32, %v2673_v26 }
 0x1cb   : > { %2005 = vmatmul.msk.f32.gmra.mxu1 %vm650_vm5, %v2243_v46 }
 0x1cc   : > { %2017 = vmatmul.msk.f32.gmra.mxu2 %vm662_vm6, %v2243_v46 }
 0x1ce   : > { %v1214_v31 = vld [vmem:[#allocation1] sm:$0xff] }
 0x1cf   : > { %1215 = vst [vmem:[#allocation1] ss:$9 sm:$0xff] %v944_v19  ;;  %1453 = vperm.xlu1 %2116, %v1214_v31   ;;  %v2679_v31 = vpop.xlane.xlu1 %621 }
 0x1d0   : > { %1216 = vst [vmem:[#allocation1 + $0x1] ss:$9 sm:$0xff] %v945_v27  ;;  %v985_v27 = vperm.slane %v2673_v26, 1  ;;  %vm663_vm9 = vcmp.eq.s32.totalorder %v2524_v32, %v2679_v31 }
 0x1d1   : > { %1217 = vst [vmem:[#allocation1 + $0x2] ss:$9 sm:$0xff] %v946_v53  ;;  %v986_v53 = vperm.slane %v2673_v26, 2 }
 0x1d2   : > { %1218 = vst [vmem:[#allocation1 + $0x3] ss:$9 sm:$0xff] %v947_v58  ;;  %v987_v58 = vperm.slane %v2673_v26, 3 }
 0x1d3   : > { %1219 = vst [vmem:[#allocation1 + $0x4] ss:$9 sm:$0xff] %v948_v59  ;;  %v988_v59 = vperm.slane %v2673_v26, 4  ;;  %2006 = vmatmul.msk.f32.gmra.mxu1 %vm651_vm7, %v2243_v46  ;;  %vm1546_vm7 = vcmask 392512  }
 0x1d4   : > { %1220 = vst [vmem:[#allocation1 + $0x5] ss:$9 sm:$0xff] %v949_v60  ;;  %v989_v60 = vperm.slane %v2673_v26, 5  ;;  %2018 = vmatmul.msk.f32.gmra.mxu2 %vm663_vm9, %v2243_v46  ;;  %vm1554_vm9 = vcmask 523712  }
 0x1d5   : > { %1221 = vst [vmem:[#allocation1 + $0x6] ss:$9 sm:$0xff] %v950_v61  ;;  %v990_v61 = vperm.slane %v2673_v26, 6 }
 0x1d6   : > { %1222 = vst [vmem:[#allocation1 + $0x7] ss:$9 sm:$0xff] %v951_v62  ;;  %v991_v62 = vperm.slane %v2673_v26, 7 }
 0x1db   : > { %2007 = vmatmul.msk.f32.gmra.mxu1 %vm652_vm8, %v2243_v46  ;;  %vm1550_vm8 = vcmask 458112  }
 0x1dd   : > { %v1223_v1 = vld [vmem:[#allocation1] sm:$0xff] }
 0x1de   : > { %1224 = vst [vmem:[#allocation1] ss:$9 sm:$0xff] %v952_v0  ;;  %1456 = vperm.xlu0 %2115, %v1223_v1   ;;  %v2696_v0 = vpop.xlane.xlu1 %601 }
 0x1df   : > { %1225 = vst [vmem:[#allocation1 + $0x1] ss:$9 sm:$0xff] %v953_v2  ;;  %v992_v1 = vperm.slane %v2696_v0, 0  ;;  %v993_v2 = vperm.slane %v2696_v0, 1  ;;  %v999_v11 = vperm.slane %v2696_v0, 7  ;;  %vm653_vm10 = vcmp.eq.s32.totalorder %v2524_v32, %v2696_v0 }
 0x1e0   : > { %1226 = vst [vmem:[#allocation1 + $0x2] ss:$9 sm:$0xff] %v954_v3 }
 0x1e1   : > { %1227 = vst [vmem:[#allocation1 + $0x3] ss:$9 sm:$0xff] %v955_v4  ;;  %v994_v4 = vperm.slane %v2696_v0, 2 }
 0x1e2   : > { %1228 = vst [vmem:[#allocation1 + $0x4] ss:$9 sm:$0xff] %v956_v49  ;;  %v995_v49 = vperm.slane %v2696_v0, 3 }
 0x1e3   : > { %1229 = vst [vmem:[#allocation1 + $0x5] ss:$9 sm:$0xff] %v957_v7  ;;  %v996_v7 = vperm.slane %v2696_v0, 4  ;;  %2008 = vmatmul.msk.f32.gmra.mxu1 %vm653_vm10, %v2243_v46  ;;  %vm1558_vm10 = vcmask 589312  }
 0x1e4   : > { %1230 = vst [vmem:[#allocation1 + $0x6] ss:$9 sm:$0xff] %v958_v10  ;;  %v997_v10 = vperm.slane %v2696_v0, 5 }
 0x1e5   : > { %1231 = vst [vmem:[#allocation1 + $0x7] ss:$9 sm:$0xff] %v959_v6  ;;  %v998_v6 = vperm.slane %v2696_v0, 6 }
 0x1e6   : > { %v2742_v40 = vpop.xlane.xlu1 %629 }
 0x1e7   : > { %vm667_vm1 = vcmp.eq.s32.totalorder %v2524_v32, %v2742_v40 }
 0x1ec   : > { %v1232_v14 = vld [vmem:[#allocation1] sm:$0xff] }
 0x1ed   : > { %1233 = vst [vmem:[#allocation1] ss:$9 sm:$0xff] %v960_v13  ;;  %1459 = vperm.xlu2 %2114, %v1232_v14   ;;  %v1000_v13 = vperm.slane %v2574_v52, 0  ;;  %v1001_v14 = vperm.slane %v2574_v52, 1 }
 0x1ee   : > { %1234 = vst [vmem:[#allocation1 + $0x1] ss:$9 sm:$0xff] %v961_v16  ;;  %v2758_v26 = vpop.xlane.xlu1 %635 }
 0x1ef   : > { %1235 = vst [vmem:[#allocation1 + $0x2] ss:$9 sm:$0xff] %v962_v55  ;;  %v1002_v55 = vperm.slane %v2574_v52, 2  ;;  %vm670_vm6 = vcmp.eq.s32.totalorder %v2524_v32, %v2758_v26 }
 0x1f0   : > { %1236 = vst [vmem:[#allocation1 + $0x3] ss:$9 sm:$0xff] %v963_v17  ;;  %v1003_v17 = vperm.slane %v2574_v52, 3 }
 0x1f1   : > { %1237 = vst [vmem:[#allocation1 + $0x4] ss:$9 sm:$0xff] %v964_v18  ;;  %v1004_v18 = vperm.slane %v2574_v52, 4 }
 0x1f2   : > { %1238 = vst [vmem:[#allocation1 + $0x5] ss:$9 sm:$0xff] %v965_v20  ;;  %v1005_v20 = vperm.slane %v2574_v52, 5 }
 0x1f3   : > { %1239 = vst [vmem:[#allocation1 + $0x6] ss:$9 sm:$0xff] %v966_v22  ;;  %v1006_v22 = vperm.slane %v2574_v52, 6 }
 0x1f4   : > { %1240 = vst [vmem:[#allocation1 + $0x7] ss:$9 sm:$0xff] %v967_v23  ;;  %v1007_v23 = vperm.slane %v2574_v52, 7  ;;  %v1010_v52 = vperm.slane %v2588_v56, 2 }
 0x1fb   : > { %v1241_v28 = vld [vmem:[#allocation1] sm:$0xff] }
 0x1fc   : > { %1242 = vst [vmem:[#allocation1] ss:$9 sm:$0xff] %v968_v8  ;;  %1462 = vperm.xlu1 %2116, %v1241_v28   ;;  %v1009_v8 = vperm.slane %v2588_v56, 1  ;;  %v2727_v28 = vpop.xlane.xlu2 %625 }
 0x1fd   : > { %1243 = vst [vmem:[#allocation1 + $0x1] ss:$9 sm:$0xff] %v969_v57  ;;  %vm665_vm12 = vcmp.eq.s32.totalorder %v2524_v32, %v2727_v28 }
 0x1fe   : > { %1244 = vst [vmem:[#allocation1 + $0x2] ss:$9 sm:$0xff] %v970_v35  ;;  %v1011_v35 = vperm.slane %v2588_v56, 3 }
 0x1ff   : > { %1245 = vst [vmem:[#allocation1 + $0x3] ss:$9 sm:$0xff] %v971_v45  ;;  %v1012_v45 = vperm.slane %v2588_v56, 4 }
 0x200   : > { %1246 = vst [vmem:[#allocation1 + $0x4] ss:$9 sm:$0xff] %v972_v37  ;;  %v1013_v37 = vperm.slane %v2588_v56, 5 }
 0x201   : > { %1247 = vst [vmem:[#allocation1 + $0x5] ss:$9 sm:$0xff] %v973_v38  ;;  %v2733_v38 = vpop.xlane.xlu0 %623 }
 0x202   : > { %1248 = vst [vmem:[#allocation1 + $0x6] ss:$9 sm:$0xff] %v974_v9  ;;  %v1014_v9 = vperm.slane %v2588_v56, 6  ;;  %vm664_vm11 = vcmp.eq.s32.totalorder %v2524_v32, %v2733_v38 }
 0x203   : > { %1249 = vst [vmem:[#allocation1 + $0x7] ss:$9 sm:$0xff] %v975_v39  ;;  %v1015_v39 = vperm.slane %v2588_v56, 7  ;;  %2019 = vmatmul.msk.f32.gmra.mxu2 %vm664_vm11, %v2243_v46  ;;  %vm1562_vm11 = vcmask 654912  }
 0x209   : > { %v2748_v56 = vpop.xlane.xlu0 %627 }
 0x20a   : > { %v2662_v43 = vld [vmem:[#allocation1] sm:$0xff]  ;;  %vm666_vm13 = vcmp.eq.s32.totalorder %v2524_v32, %v2748_v56 }
 0x20b   : > { %1251 = vst [vmem:[#allocation1] ss:$9 sm:$0xff] %v976_v41  ;;  %v2745_v41 = vpop.xlane.xlu2 %633  ;;  %2020 = vmatmul.msk.f32.gmra.mxu2 %vm665_vm12, %v2243_v46  ;;  %vm1566_vm12 = vcmask 720512  }
 0x20c   : > { %1252 = vst [vmem:[#allocation1 + $0x1] ss:$9 sm:$0xff] %v977_v44  ;;  %v1016_v44 = vperm.slane %v2597_v5, 0  ;;  %vm669_vm5 = vcmp.eq.s32.totalorder %v2524_v32, %v2745_v41 }
 0x20d   : > { %1253 = vst [vmem:[#allocation1 + $0x2] ss:$9 sm:$0xff] %v978_v15  ;;  %v1017_v15 = vperm.slane %v2597_v5, 1  ;;  %2024 = vmatmul.msk.f32.vlgmr.msrb.gmra.mxu3 %vm669_vm5, %v2243_v46 }
 0x20e   : > { %1254 = vst [vmem:[#allocation1 + $0x3] ss:$9 sm:$0xff] %v979_v54 }
 0x20f   : > { %1255 = vst [vmem:[#allocation1 + $0x4] ss:$9 sm:$0xff] %v980_v48  ;;  %v1018_v48 = vperm.slane %v2597_v5, 2 }
 0x210   : > { %1256 = vst [vmem:[#allocation1 + $0x5] ss:$9 sm:$0xff] %v981_v25  ;;  %v1019_v25 = vperm.slane %v2597_v5, 3 }
 0x211   : > { %1257 = vst [vmem:[#allocation1 + $0x6] ss:$9 sm:$0xff] %v982_v51  ;;  %v1020_v51 = vperm.slane %v2597_v5, 4 }
 0x212   : > { %1258 = vst [vmem:[#allocation1 + $0x7] ss:$9 sm:$0xff] %v983_v63  ;;  %v1021_v63 = vperm.slane %v2597_v5, 5 }
 0x213   : > { %2021 = vmatmul.msk.f32.gmra.mxu2 %vm666_vm13, %v2243_v46  ;;  %vm1578_vm13 = vcmask 917312  }
 0x215   : > { %2025 = vmatmul.msk.f32.gmra.mxu3 %vm670_vm6, %v2243_v46 }
 0x219   : > { %v1259_v19 = vld [vmem:[#allocation1] sm:$0xff] }
 0x21a   : > { %1260 = vst [vmem:[#allocation1] ss:$9 sm:$0xff] %v984_v34  ;;  %1468 = vperm.xlu2 %2114, %v1259_v19   ;;  %v1022_v34 = vperm.slane %v2597_v5, 6  ;;  %v1433_v19 = vpop.permute.xlu2 %1432 }
 0x21b   : > { %1261 = vst [vmem:[#allocation1 + $0x1] ss:$9 sm:$0xff] %v985_v27  ;;  %v1023_v27 = vperm.slane %v2597_v5, 7  ;;  %v2775_v5 = vadd.s32 4294967288, %v2524_v32  ;;  %2022 = vmatmul.msk.f32.gmra.mxu2 %vm667_vm1, %v2243_v46  ;;  %vm1586_vm1 = vcmask 1048512  }
 0x21c   : > { %1262 = vst [vmem:[#allocation1 + $0x2] ss:$9 sm:$0xff] %v986_v53  ;;  %v2762_v53 = vpop.xlane.xlu0 %631 }
 0x21d   : > { %1263 = vst [vmem:[#allocation1 + $0x3] ss:$9 sm:$0xff] %v987_v58  ;;  %v2768_v58 = vadd.s32 4294967280, %v2524_v32  ;;  %vm668_vm3 = vcmp.eq.s32.totalorder %v2524_v32, %v2762_v53 }
 0x21e   : > { %1264 = vst [vmem:[#allocation1 + $0x4] ss:$9 sm:$0xff] %v988_v59  ;;  %v1024_v59 = vperm.slane %v2609_v21, 0 }
 0x21f   : > { %1265 = vst [vmem:[#allocation1 + $0x5] ss:$9 sm:$0xff] %v989_v60  ;;  %v1439_v60 = vpop.permute.xlu1 %1438 }
 0x220   : > { %1266 = vst [vmem:[#allocation1 + $0x6] ss:$9 sm:$0xff] %v990_v61  ;;  %v2772_v61 = vadd.s32 4294967272, %v2524_v32 }
 0x221   : > { %1267 = vst [vmem:[#allocation1 + $0x7] ss:$9 sm:$0xff] %v991_v62  ;;  %v1025_v62 = vperm.slane %v2609_v21, 1 }
 0x223   : > { %2023 = vmatmul.msk.f32.gmra.mxu2 %vm668_vm3, %v2243_v46  ;;  %v1046_v46 = vperm.slane %v2635_v50, 6  ;;  %vm1624_vm3 = vcmp.lt.s32.totalorder %v637_v30, 256 }
 0x228   : > { %v1268_v3 = vld [vmem:[#allocation1] sm:$0xff] }
 0x229   : > { %1269 = vst [vmem:[#allocation1] ss:$9 sm:$0xff] %v992_v1  ;;  %1471 = vperm.xlu1 %2116, %v1268_v3   ;;  %v1442_v1 = vpop.permute.xlu2 %1441  ;;  %v1026_v3 = vperm.slane %v2609_v21, 2 }
 0x22a   : > { %1270 = vst [vmem:[#allocation1 + $0x1] ss:$9 sm:$0xff] %v993_v2  ;;  %v1436_v2 = vpop.permute.xlu0 %1435 }
 0x22b   : > { %1271 = vst [vmem:[#allocation1 + $0x2] ss:$9 sm:$0xff] %v994_v4  ;;  %v1527_v4 = vperm.slane %v1433_v19, %v2524_v32  ;;  %v2118_v19 = vld [vmem:[%s2349_s26 + $0x18] sm:$0xff] }
 0x22c   : > { %1272 = vst [vmem:[#allocation1 + $0x3] ss:$9 sm:$0xff] %v995_v49  ;;  %v1529_v49 = vperm.slane %v1436_v2, %v2775_v5 }
 0x22d   : > { %1273 = vst [vmem:[#allocation1 + $0x4] ss:$9 sm:$0xff] %v996_v7  ;;  %v1027_v7 = vperm.slane %v2609_v21, 3 }
 0x22e   : > { %1274 = vst [vmem:[#allocation1 + $0x5] ss:$9 sm:$0xff] %v997_v10  ;;  %v1533_v10 = vperm.slane %v1439_v60, %v2768_v58  ;;  %v2828_v60 = vpop.f32.mrf.mxu2 }
 0x22f   : > { %1275 = vst [vmem:[#allocation1 + $0x6] ss:$9 sm:$0xff] %v998_v6  ;;  %v1028_v6 = vperm.slane %v2609_v21, 4 }
 0x230   : > { %1276 = vst [vmem:[#allocation1 + $0x7] ss:$9 sm:$0xff] %v999_v11  ;;  %v1537_v11 = vperm.slane %v1442_v1, %v2772_v61  ;;  %v1049_v1 = vperm.slane %v2642_v12, 1 }
 0x231   : > { %863 = vst.msk [vmem:[%s2584_s28 + $0x78] sm:$0xff] %vm328_vm0, %v2828_v60 }
 0x237   : > { %v2708_v16 = vld [vmem:[#allocation1] sm:$0xff] }
 0x238   : > { %1278 = vst [vmem:[#allocation1] ss:$9 sm:$0xff] %v1000_v13  ;;  %v1531_v13 = vsel %vm1530_vm14, %v1529_v49, %v1527_v4  ;;  %v1050_v4 = vperm.slane %v2642_v12, 2  ;;  %v1051_v49 = vperm.slane %v2642_v12, 3 }
 0x239   : > { %1279 = vst [vmem:[#allocation1 + $0x1] ss:$9 sm:$0xff] %v1001_v14  ;;  %v1029_v14 = vperm.slane %v2609_v21, 5 }
 0x23a   : > { %1280 = vst [vmem:[#allocation1 + $0x2] ss:$9 sm:$0xff] %v1002_v55  ;;  %v1535_v55 = vsel %vm1534_vm15, %v1533_v10, %v1531_v13  ;;  %v1052_v10 = vperm.slane %v2642_v12, 4  ;;  %v1053_v13 = vperm.slane %v2642_v12, 5 }
 0x23b   : > { %1281 = vst [vmem:[#allocation1 + $0x3] ss:$9 sm:$0xff] %v1003_v17  ;;  %v1030_v17 = vperm.slane %v2609_v21, 6 }
 0x23c   : > { %1282 = vst [vmem:[#allocation1 + $0x4] ss:$9 sm:$0xff] %v1004_v18  ;;  %v1539_v18 = vsel %vm1538_vm2, %v1537_v11, %v1535_v55  ;;  %v2844_v11 = vadd.s32 4294967248, %v2524_v32 }
 0x23d   : > { %1283 = vst [vmem:[#allocation1 + $0x5] ss:$9 sm:$0xff] %v1005_v20  ;;  %v1031_v20 = vperm.slane %v2609_v21, 7  ;;  %v2802_v21 = vadd.s32 4294967264, %v2524_v32 }
 0x23e   : > { %1284 = vst [vmem:[#allocation1 + $0x6] ss:$9 sm:$0xff] %v1006_v22  ;;  %v1032_v22 = vperm.slane %v2621_v29, 0 }
 0x23f   : > { %1285 = vst [vmem:[#allocation1 + $0x7] ss:$9 sm:$0xff] %v1007_v23  ;;  %v1033_v23 = vperm.slane %v2621_v29, 1 }
 0x246   : > { %v1286_v57 = vld [vmem:[#allocation1] sm:$0xff] }
 0x247   : > { %1287 = vst [vmem:[#allocation1] ss:$9 sm:$0xff] %v1008_v24  ;;  %1477 = vperm.xlu2 %2114, %v1286_v57   ;;  %v1035_v57 = vperm.slane %v2621_v29, 3 }
 0x248   : > { %1288 = vst [vmem:[#allocation1 + $0x1] ss:$9 sm:$0xff] %v1009_v8  ;;  %v1034_v8 = vperm.slane %v2621_v29, 2 }
 0x249   : > { %1289 = vst [vmem:[#allocation1 + $0x2] ss:$9 sm:$0xff] %v1010_v52  ;;  %v1036_v52 = vperm.slane %v2621_v29, 4 }
 0x24a   : > { %1290 = vst [vmem:[#allocation1 + $0x3] ss:$9 sm:$0xff] %v1011_v35  ;;  %v1445_v35 = vpop.permute.xlu2 %1444 }
 0x24b   : > { %1291 = vst [vmem:[#allocation1 + $0x4] ss:$9 sm:$0xff] %v1012_v45  ;;  %v1037_v45 = vperm.slane %v2621_v29, 5 }
 0x24c   : > { %1292 = vst [vmem:[#allocation1 + $0x5] ss:$9 sm:$0xff] %v1013_v37  ;;  %v1038_v37 = vperm.slane %v2621_v29, 6 }
 0x24d   : > { %1293 = vst [vmem:[#allocation1 + $0x6] ss:$9 sm:$0xff] %v1014_v9  ;;  %v1541_v9 = vperm.slane %v1445_v35, %v2802_v21  ;;  %v2120_v35 = vld [vmem:[%s2349_s26 + $0x28] sm:$0xff] }
 0x24e   : > { %1294 = vst [vmem:[#allocation1 + $0x7] ss:$9 sm:$0xff] %v1015_v39  ;;  %v1039_v39 = vperm.slane %v2621_v29, 7  ;;  %v1042_v29 = vperm.slane %v2635_v50, 2 }
 0x255   : > { %v1295_v54 = vld [vmem:[#allocation1] sm:$0xff] }
 0x256   : > { %1296 = vst [vmem:[#allocation1] ss:$9 sm:$0xff] %v1016_v44  ;;  %1480 = vperm.xlu1 %2116, %v1295_v54   ;;  %v2813_v44 = vsel %vm1542_vm4, %v1541_v9, %v1539_v18  ;;  %v1041_v54 = vperm.slane %v2635_v50, 1  ;;  %v1054_v18 = vperm.slane %v2642_v12, 6 }
 0x257   : > { %1297 = vst [vmem:[#allocation1 + $0x1] ss:$9 sm:$0xff] %v1017_v15  ;;  %v1040_v15 = vperm.slane %v2635_v50, 0 }
 0x258   : > { %1298 = vst [vmem:[#allocation1 + $0x2] ss:$9 sm:$0xff] %v1018_v48 }
 0x259   : > { %1299 = vst [vmem:[#allocation1 + $0x3] ss:$9 sm:$0xff] %v1019_v25  ;;  %v1043_v25 = vperm.slane %v2635_v50, 3 }
 0x25a   : > { %1300 = vst [vmem:[#allocation1 + $0x4] ss:$9 sm:$0xff] %v1020_v51  ;;  %v1044_v51 = vperm.slane %v2635_v50, 4 }
 0x25b   : > { %1301 = vst [vmem:[#allocation1 + $0x5] ss:$9 sm:$0xff] %v1021_v63  ;;  %v1045_v63 = vperm.slane %v2635_v50, 5 }
 0x25c   : > { %1302 = vst [vmem:[#allocation1 + $0x6] ss:$9 sm:$0xff] %v1022_v34  ;;  %v1047_v34 = vperm.slane %v2635_v50, 7 }
 0x25d   : > { %1303 = vst [vmem:[#allocation1 + $0x7] ss:$9 sm:$0xff] %v1023_v27  ;;  %v1630_v27 = vsub.f32 %v2623_v33, %v2118_v19 }
 0x264   : > { %v1304_v0 = vld [vmem:[#allocation1] sm:$0xff] }
 0x265   : > { %1305 = vst [vmem:[#allocation1] ss:$9 sm:$0xff] %v1024_v59  ;;  %1483 = vperm.xlu2 %2114, %v1304_v0   ;;  %v1662_v59 = vmul.f32 %v1630_v27, %v1630_v27  ;;  %v764_v0 = vpop.f32.mrf.mxu1  ;;  %v1061_v27 = vperm.slane %v2652_v36, 5 }
 0x266   : > { %1306 = vst [vmem:[#allocation1 + $0x1] ss:$9 sm:$0xff] %v1025_v62  ;;  %v1048_v62 = vperm.slane %v2642_v12, 0 }
 0x267   : > { %1307 = vst [vmem:[#allocation1 + $0x2] ss:$9 sm:$0xff] %v1026_v3  ;;  %v1696_v2 = vsel %vm328_vm0, %v1662_v59, 0.0  ;;  %v2119_v3 = vld [vmem:[%s2349_s26 + $0x20] sm:$0xff]  ;;  %v1062_v59 = vperm.slane %v2652_v36, 6 }
 0x268   : > { %1308 = vst [vmem:[#allocation1 + $0x3] ss:$9 sm:$0xff] %v1027_v7  ;;  %v1631_v33 = vsub.f32 %v764_v0, %v2119_v3 }
 0x269   : > { %1309 = vst [vmem:[#allocation1 + $0x4] ss:$9 sm:$0xff] %v1028_v6  ;;  %v1697_v6 = vadd.f32 %v1696_v2, %v2617_v42  ;;  %v1448_v42 = vpop.permute.xlu1 %1447 }
 0x26a   : > { %1310 = vst [vmem:[#allocation1 + $0x5] ss:$9 sm:$0xff] %v1029_v14  ;;  %v1663_v7 = vmul.f32 %v1631_v33, %v1631_v33  ;;  %v1451_v14 = vpop.permute.xlu2 %1450 }
 0x26b   : > { %1311 = vst [vmem:[#allocation1 + $0x6] ss:$9 sm:$0xff] %v1030_v17  ;;  %v2849_v17 = vadd.s32 4294967256, %v2524_v32 }
 0x26c   : > { %1312 = vst [vmem:[#allocation1 + $0x7] ss:$9 sm:$0xff] %v1031_v20  ;;  %v1698_v55 = vsel %vm328_vm0, %v1663_v7, 0.0  ;;  %v2122_v7 = vld [vmem:[%s2349_s26 + $0x38] sm:$0xff] }
 0x26d   : > { %852 = vst.msk [vmem:[%s2584_s28 + $0x20] sm:$0xff] %vm328_vm0, %v764_v0  ;;  %v1699_v20 = vadd.f32 %v1698_v55, %v1697_v6  ;;  %v2882_v0 = vadd.s32 4294967240, %v2524_v32  ;;  %v2898_v6 = vadd.s32 4294967224, %v2524_v32  ;;  %v2902_v55 = vadd.s32 4294967232, %v2524_v32 }
 0x271   : > { %v1454_v3 = vpop.permute.xlu1 %1453 }
 0x272   : > { %v1553_v33 = vperm.slane %v1454_v3, %v2882_v0  ;;  %v1074_v3 = vperm.slane %v2679_v31, 2 }
 0x273   : > { %v1313_v24 = vld [vmem:[#allocation1] sm:$0xff] }
 0x274   : > { %1314 = vst [vmem:[#allocation1] ss:$9 sm:$0xff] %v1032_v22  ;;  %1486 = vperm.xlu1 %2116, %v1313_v24   ;;  %v2852_v22 = vpop.f32.mrf.mxu2  ;;  %v1545_v24 = vperm.slane %v1448_v42, %v2849_v17 }
 0x275   : > { %1315 = vst [vmem:[#allocation1 + $0x1] ss:$9 sm:$0xff] %v1033_v23  ;;  %v1055_v23 = vperm.slane %v2642_v12, 7 }
 0x276   : > { %1316 = vst [vmem:[#allocation1 + $0x2] ss:$9 sm:$0xff] %v1034_v8  ;;  %v1549_v8 = vperm.slane %v1451_v14, %v2844_v11 }
 0x277   : > { %1317 = vst [vmem:[#allocation1 + $0x3] ss:$9 sm:$0xff] %v1035_v57  ;;  %v767_v57 = vpop.f32.mrf.mxu1 }
 0x278   : > { %1318 = vst [vmem:[#allocation1 + $0x4] ss:$9 sm:$0xff] %v1036_v52  ;;  %v1547_v52 = vsel %vm1546_vm7, %v1545_v24, %v2813_v44  ;;  %v1057_v44 = vperm.slane %v2652_v36, 1  ;;  %v1065_v24 = vperm.slane %v2666_v47, 1 }
 0x279   : > { %1319 = vst [vmem:[#allocation1 + $0x5] ss:$9 sm:$0xff] %v1037_v45  ;;  %v1632_v45 = vsub.f32 %v767_v57, %v2120_v35  ;;  %v1551_v12 = vsel %vm1550_vm8, %v1549_v8, %v1547_v52  ;;  %v1066_v52 = vperm.slane %v2666_v47, 2 }
 0x27a   : > { %1320 = vst [vmem:[#allocation1 + $0x6] ss:$9 sm:$0xff] %v1038_v37 }
 0x27b   : > { %1321 = vst [vmem:[#allocation1 + $0x7] ss:$9 sm:$0xff] %v1039_v39  ;;  %v1664_v37 = vmul.f32 %v1632_v45, %v1632_v45 }
 0x27c   : > { %864 = vst.msk [vmem:[%s2584_s28 + $0x80] sm:$0xff] %vm328_vm0, %v2852_v22 }
 0x27d   : > { %853 = vst.msk [vmem:[%s2584_s28 + $0x28] sm:$0xff] %vm328_vm0, %v767_v57  ;;  %v1700_v9 = vsel %vm328_vm0, %v1664_v37, 0.0 }
 0x27e   : > { %v1701_v39 = vadd.f32 %v1700_v9, %v1699_v20  ;;  %v2123_v9 = vld [vmem:[%s2349_s26 + $0x40] sm:$0xff] }
 0x282   : > { %v1322_v48 = vld [vmem:[#allocation1] sm:$0xff] }
 0x283   : > { %1323 = vst [vmem:[#allocation1] ss:$9 sm:$0xff] %v1040_v15  ;;  %1489 = vperm.xlu2 %2114, %v1322_v48   ;;  %v2867_v15 = vpop.f32.mrf.mxu2 }
 0x284   : > { %1324 = vst [vmem:[#allocation1 + $0x1] ss:$9 sm:$0xff] %v1041_v54  ;;  %v1056_v54 = vperm.slane %v2652_v36, 0 }
 0x285   : > { %1325 = vst [vmem:[#allocation1 + $0x2] ss:$9 sm:$0xff] %v1042_v29  ;;  %v770_v29 = vpop.f32.mrf.mxu1 }
 0x286   : > { %1326 = vst [vmem:[#allocation1 + $0x3] ss:$9 sm:$0xff] %v1043_v25  ;;  %v1058_v25 = vperm.slane %v2652_v36, 2 }
 0x287   : > { %1327 = vst [vmem:[#allocation1 + $0x4] ss:$9 sm:$0xff] %v1044_v51  ;;  %v2121_v51 = vld [vmem:[%s2349_s26 + $0x30] sm:$0xff] }
 0x288   : > { %1328 = vst [vmem:[#allocation1 + $0x5] ss:$9 sm:$0xff] %v1045_v63  ;;  %v1633_v63 = vsub.f32 %v770_v29, %v2121_v51  ;;  %v1071_v51 = vperm.slane %v2666_v47, 7 }
 0x289   : > { %1329 = vst [vmem:[#allocation1 + $0x6] ss:$9 sm:$0xff] %v1046_v46  ;;  %v1059_v46 = vperm.slane %v2652_v36, 3 }
 0x28a   : > { %1330 = vst [vmem:[#allocation1 + $0x7] ss:$9 sm:$0xff] %v1047_v34  ;;  %v1060_v34 = vperm.slane %v2652_v36, 4  ;;  %v1665_v19 = vmul.f32 %v1633_v63, %v1633_v63 }
 0x28b   : > { %865 = vst.msk [vmem:[%s2584_s28 + $0x88] sm:$0xff] %vm328_vm0, %v2867_v15 }
 0x28c   : > { %854 = vst.msk [vmem:[%s2584_s28 + $0x30] sm:$0xff] %vm328_vm0, %v770_v29 }
 0x291   : > { %v1331_v50 = vld [vmem:[#allocation1] sm:$0xff] }
 0x292   : > { %1332 = vst [vmem:[#allocation1] ss:$9 sm:$0xff] %v1048_v62  ;;  %1492 = vperm.xlu1 %2116, %v1331_v50   ;;  %v1702_v62 = vsel %vm328_vm0, %v1665_v19, 0.0  ;;  %v2885_v50 = vpop.f32.mrf.mxu2 }
 0x293   : > { %1333 = vst [vmem:[#allocation1 + $0x1] ss:$9 sm:$0xff] %v1049_v1  ;;  %v1063_v1 = vperm.slane %v2652_v36, 7  ;;  %v1703_v2 = vadd.f32 %v1702_v62, %v1701_v39 }
 0x294   : > { %1334 = vst [vmem:[#allocation1 + $0x2] ss:$9 sm:$0xff] %v1050_v4  ;;  %v773_v4 = vpop.f32.mrf.mxu1 }
 0x295   : > { %1335 = vst [vmem:[#allocation1 + $0x3] ss:$9 sm:$0xff] %v1051_v49  ;;  %v1555_v49 = vsel %vm1554_vm9, %v1553_v33, %v1551_v12  ;;  %v1067_v12 = vperm.slane %v2666_v47, 3 }
 0x296   : > { %1336 = vst [vmem:[#allocation1 + $0x4] ss:$9 sm:$0xff] %v1052_v10  ;;  %v1634_v10 = vsub.f32 %v773_v4, %v2122_v7  ;;  %v1076_v7 = vperm.slane %v2679_v31, 4 }
 0x297   : > { %1337 = vst [vmem:[#allocation1 + $0x5] ss:$9 sm:$0xff] %v1053_v13  ;;  %v1460_v13 = vpop.permute.xlu2 %1459 }
 0x298   : > { %1338 = vst [vmem:[#allocation1 + $0x6] ss:$9 sm:$0xff] %v1054_v18  ;;  %v1666_v36 = vmul.f32 %v1634_v10, %v1634_v10  ;;  %v1064_v18 = vperm.slane %v2666_v47, 0  ;;  %v1561_v35 = vperm.slane %v1460_v13, %v2898_v6  ;;  %v1078_v13 = vperm.slane %v2679_v31, 6 }
 0x299   : > { %1339 = vst [vmem:[#allocation1 + $0x7] ss:$9 sm:$0xff] %v1055_v23  ;;  %v1457_v23 = vpop.permute.xlu0 %1456 }
 0x29a   : > { %866 = vst.msk [vmem:[%s2584_s28 + $0x90] sm:$0xff] %vm328_vm0, %v2885_v50  ;;  %v1704_v14 = vsel %vm328_vm0, %v1666_v36, 0.0  ;;  %v2905_v42 = vpop.f32.mrf.mxu2  ;;  %v1557_v57 = vperm.slane %v1457_v23, %v2902_v55  ;;  %v1077_v36 = vperm.slane %v2679_v31, 5  ;;  %v1080_v23 = vperm.slane %v2733_v38, 0 }
 0x29b   : > { %855 = vst.msk [vmem:[%s2584_s28 + $0x38] sm:$0xff] %vm328_vm0, %v773_v4  ;;  %v1705_v20 = vadd.f32 %v1704_v14, %v1703_v2  ;;  %v1463_v2 = vpop.permute.xlu1 %1462  ;;  %v1075_v4 = vperm.slane %v2679_v31, 3  ;;  %v1079_v14 = vperm.slane %v2679_v31, 7 }
 0x29c   : > { %867 = vst.msk [vmem:[%s2584_s28 + $0x98] sm:$0xff] %vm328_vm0, %v2905_v42  ;;  %v776_v45 = vpop.f32.mrf.mxu1  ;;  %v1559_v37 = vsel %vm1558_vm10, %v1557_v57, %v1555_v49  ;;  %v1083_v57 = vperm.slane %v2733_v38, 3 }
 0x29d   : > { %v1635_v39 = vsub.f32 %v776_v45, %v2123_v9  ;;  %856 = vst.msk [vmem:[%s2584_s28 + $0x40] sm:$0xff] %vm328_vm0, %v776_v45  ;;  %v1086_v45 = vperm.slane %v2733_v38, 6 }
 0x29f   : > { %v1667_v29 = vmul.f32 %v1635_v39, %v1635_v39  ;;  %v1088_v39 = vperm.slane %v2727_v28, 0 }
 0x2a0   : > { %v1340_v48 = vld [vmem:[#allocation1] sm:$0xff] }
 0x2a1   : > { %1341 = vst [vmem:[#allocation1] ss:$9 sm:$0xff] %v1056_v54  ;;  %1495 = vperm.xlu2 %2114, %v1340_v48   ;;  %v1068_v54 = vperm.slane %v2666_v47, 4  ;;  %v1069_v48 = vperm.slane %v2666_v47, 5  ;;  %v1706_v63 = vsel %vm328_vm0, %v1667_v29, 0.0  ;;  %v1092_v29 = vperm.slane %v2727_v28, 4 }
 0x2a2   : > { %1342 = vst [vmem:[#allocation1 + $0x1] ss:$9 sm:$0xff] %v1057_v44  ;;  %v1563_v44 = vsel %vm1562_vm11, %v1561_v35, %v1559_v37  ;;  %v1085_v35 = vperm.slane %v2733_v38, 5 }
 0x2a3   : > { %1343 = vst [vmem:[#allocation1 + $0x2] ss:$9 sm:$0xff] %v1058_v25  ;;  %v1070_v25 = vperm.slane %v2666_v47, 6  ;;  %v1072_v47 = vperm.slane %v2679_v31, 0 }
 0x2a4   : > { %1344 = vst [vmem:[#allocation1 + $0x3] ss:$9 sm:$0xff] %v1059_v46  ;;  %v2923_v46 = vadd.f32 %v1706_v63, %v1705_v20  ;;  %v2929_v19 = vpop.f32.mrf.mxu1  ;;  %v1095_v63 = vperm.slane %v2727_v28, 7 }
 0x2a5   : > { %1345 = vst [vmem:[#allocation1 + $0x4] ss:$9 sm:$0xff] %v1060_v34  ;;  %v2925_v34 = vpop.f32.mrf.mxu2 }
 0x2a6   : > { %1346 = vst [vmem:[#allocation1 + $0x5] ss:$9 sm:$0xff] %v1061_v27  ;;  %v2939_v27 = vadd.s32 4294967216, %v2524_v32 }
 0x2a7   : > { %1347 = vst [vmem:[#allocation1 + $0x6] ss:$9 sm:$0xff] %v1062_v59  ;;  %v1073_v59 = vperm.slane %v2679_v31, 1  ;;  %v1081_v31 = vperm.slane %v2733_v38, 1 }
 0x2a8   : > { %1348 = vst [vmem:[#allocation1 + $0x7] ss:$9 sm:$0xff] %v1063_v1  ;;  %v1565_v33 = vperm.slane %v1463_v2, %v2939_v27 }
 0x2a9   : > { %868 = vst.msk [vmem:[%s2584_s28 + $0xa0] sm:$0xff] %vm328_vm0, %v2925_v34 }
 0x2aa   : > { %857 = vst.msk [vmem:[%s2584_s28 + $0x48] sm:$0xff] %vm328_vm0, %v2929_v19  ;;  %v2951_v10 = vsel %vm1566_vm12, %v1565_v33, %v1563_v44 }
 0x2ac   : > { %v2947_v49 = vpop.f32.mrf.mxu1 }
 0x2ad   : > { %v2942_v1 = vpop.f32.mrf.mxu2  ;;  %858 = vst.msk [vmem:[%s2584_s28 + $0x50] sm:$0xff] %vm328_vm0, %v2947_v49 }
 0x2ae   : > { %869 = vst.msk [vmem:[%s2584_s28 + $0xa8] sm:$0xff] %vm328_vm0, %v2942_v1 }
 0x2af   : > { %v1349_v8 = vld [vmem:[#allocation1] sm:$0xff] }
 0x2b0   : > { %1350 = vst [vmem:[#allocation1] ss:$9 sm:$0xff] %v1064_v18  ;;  %1498 = vperm.xlu1 %2116, %v1349_v8   ;;  %v1082_v8 = vperm.slane %v2733_v38, 2 }
 0x2b1   : > { %1351 = vst [vmem:[#allocation1 + $0x1] ss:$9 sm:$0xff] %v1065_v24 }
 0x2b2   : > { %1352 = vst [vmem:[#allocation1 + $0x2] ss:$9 sm:$0xff] %v1066_v52  ;;  %v1084_v52 = vperm.slane %v2733_v38, 4 }
 0x2b3   : > { %1353 = vst [vmem:[#allocation1 + $0x3] ss:$9 sm:$0xff] %v1067_v12  ;;  %v1087_v12 = vperm.slane %v2733_v38, 7  ;;  %v1091_v38 = vperm.slane %v2727_v28, 3 }
 0x2b4   : > { %1354 = vst [vmem:[#allocation1 + $0x4] ss:$9 sm:$0xff] %v1068_v54  ;;  %v785_v20 = vpop.f32.mrf.mxu1  ;;  %v1089_v54 = vperm.slane %v2727_v28, 1 }
 0x2b5   : > { %1355 = vst [vmem:[#allocation1 + $0x5] ss:$9 sm:$0xff] %v1069_v48  ;;  %v2956_v18 = vpop.f32.mrf.mxu2  ;;  %v1090_v48 = vperm.slane %v2727_v28, 2 }
 0x2b6   : > { %1356 = vst [vmem:[#allocation1 + $0x6] ss:$9 sm:$0xff] %v1070_v25  ;;  %v1093_v25 = vperm.slane %v2727_v28, 5 }
 0x2b7   : > { %1357 = vst [vmem:[#allocation1 + $0x7] ss:$9 sm:$0xff] %v1071_v51  ;;  %v1094_v51 = vperm.slane %v2727_v28, 6 }
 0x2b8   : > { %870 = vst.msk [vmem:[%s2584_s28 + $0xb0] sm:$0xff] %vm328_vm0, %v2956_v18 }
 0x2b9   : > { %859 = vst.msk [vmem:[%s2584_s28 + $0x58] sm:$0xff] %vm328_vm0, %v785_v20 }
 0x2bc   : > { %v788_v9 = vpop.f32.mrf.mxu1 }
 0x2bd   : > { %v2977_v37 = vpop.f32.mrf.mxu2  ;;  %860 = vst.msk [vmem:[%s2584_s28 + $0x60] sm:$0xff] %vm328_vm0, %v788_v9 }
 0x2be   : > { %v1358_v62 = vld [vmem:[#allocation1] sm:$0xff]  ;;  %871 = vst.msk [vmem:[%s2584_s28 + $0xb8] sm:$0xff] %vm328_vm0, %v2977_v37 }
 0x2bf   : > { %1359 = vst [vmem:[#allocation1] ss:$9 sm:$0xff] %v1072_v47  ;;  %1501 = vperm.xlu2 %2114, %v1358_v62  }
 0x2c0   : > { %1360 = vst [vmem:[#allocation1 + $0x1] ss:$9 sm:$0xff] %v1073_v59  ;;  %v2124_v59 = vld [vmem:[%s2349_s26 + $0x48] sm:$0xff] }
 0x2c1   : > { %1361 = vst [vmem:[#allocation1 + $0x2] ss:$9 sm:$0xff] %v1074_v3  ;;  %v1636_v62 = vsub.f32 %v2929_v19, %v2124_v59  ;;  %v2125_v3 = vld [vmem:[%s2349_s26 + $0x50] sm:$0xff]  ;;  %v1097_v19 = vperm.slane %v2748_v56, 1 }
 0x2c2   : > { %1362 = vst [vmem:[#allocation1 + $0x3] ss:$9 sm:$0xff] %v1075_v4  ;;  %v1637_v33 = vsub.f32 %v2947_v49, %v2125_v3  ;;  %v2126_v4 = vld [vmem:[%s2349_s26 + $0x58] sm:$0xff]  ;;  %v2128_v49 = vld [vmem:[%s2349_s26 + $0x68] sm:$0xff] }
 0x2c3   : > { %1363 = vst [vmem:[#allocation1 + $0x4] ss:$9 sm:$0xff] %v1076_v7  ;;  %v1668_v28 = vmul.f32 %v1636_v62, %v1636_v62  ;;  %v1638_v7 = vsub.f32 %v785_v20, %v2126_v4  ;;  %v1099_v20 = vperm.slane %v2748_v56, 3 }
 0x2c4   : > { %1364 = vst [vmem:[#allocation1 + $0x5] ss:$9 sm:$0xff] %v1077_v36  ;;  %v791_v2 = vpop.f32.mrf.mxu1  ;;  %v1669_v36 = vmul.f32 %v1637_v33, %v1637_v33  ;;  %v2131_v33 = vld [vmem:[%s2349_s26 + $0x70] sm:$0xff] }
 0x2c5   : > { %1365 = vst [vmem:[#allocation1 + $0x6] ss:$9 sm:$0xff] %v1078_v13  ;;  %v2992_v47 = vpop.f32.mrf.mxu2  ;;  %v2127_v13 = vld [vmem:[%s2349_s26 + $0x60] sm:$0xff] }
 0x2c6   : > { %1366 = vst [vmem:[#allocation1 + $0x7] ss:$9 sm:$0xff] %v1079_v14  ;;  %v1639_v14 = vsub.f32 %v788_v9, %v2127_v13 }
 0x2c7   : > { %872 = vst.msk [vmem:[%s2584_s28 + $0xc0] sm:$0xff] %vm328_vm0, %v2992_v47 }
 0x2c8   : > { %861 = vst.msk [vmem:[%s2584_s28 + $0x68] sm:$0xff] %vm328_vm0, %v791_v2 }
 0x2cc   : > { %v794_v62 = vpop.f32.mrf.mxu1 }
 0x2cd   : > { %v1367_v24 = vld [vmem:[#allocation1] sm:$0xff]  ;;  %862 = vst.msk [vmem:[%s2584_s28 + $0x70] sm:$0xff] %vm328_vm0, %v794_v62 }
 0x2ce   : > { %1368 = vst [vmem:[#allocation1] ss:$9 sm:$0xff] %v1080_v23  ;;  %1504 = vperm.xlu1 %2116, %v1367_v24   ;;  %v1096_v23 = vperm.slane %v2748_v56, 0  ;;  %v1670_v24 = vmul.f32 %v1638_v7, %v1638_v7  ;;  %v2132_v7 = vld [vmem:[%s2349_s26 + $0x88] sm:$0xff] }
 0x2cf   : > { %1369 = vst [vmem:[#allocation1 + $0x1] ss:$9 sm:$0xff] %v1081_v31  ;;  %v1708_v31 = vsel %vm328_vm0, %v1668_v28, 0.0  ;;  %v1641_v28 = vsub.f32 %v794_v62, %v2131_v33  ;;  %v1110_v62 = vperm.slane %v2742_v40, 6 }
 0x2d0   : > { %1370 = vst [vmem:[#allocation1 + $0x2] ss:$9 sm:$0xff] %v1082_v8  ;;  %v1709_v9 = vadd.f32 %v1708_v31, %v2923_v46 }
 0x2d1   : > { %1371 = vst [vmem:[#allocation1 + $0x3] ss:$9 sm:$0xff] %v1083_v57  ;;  %v1640_v57 = vsub.f32 %v791_v2, %v2128_v49  ;;  %v2130_v2 = vld [vmem:[%s2349_s26 + $0x80] sm:$0xff]  ;;  %v1673_v13 = vmul.f32 %v1641_v28, %v1641_v28  ;;  %v1111_v28 = vperm.slane %v2742_v40, 7 }
 0x2d2   : > { %1372 = vst [vmem:[#allocation1 + $0x4] ss:$9 sm:$0xff] %v1084_v52  ;;  %v1098_v52 = vperm.slane %v2748_v56, 2  ;;  %v1643_v3 = vsub.f32 %v2852_v22, %v2130_v2 }
 0x2d3   : > { %1373 = vst [vmem:[#allocation1 + $0x5] ss:$9 sm:$0xff] %v1085_v35  ;;  %v1710_v35 = vsel %vm328_vm0, %v1669_v36, 0.0  ;;  %v1644_v36 = vsub.f32 %v2867_v15, %v2132_v7  ;;  %v1718_v31 = vsel %vm328_vm0, %v1673_v13, 0.0 }
 0x2d4   : > { %1374 = vst [vmem:[#allocation1 + $0x6] ss:$9 sm:$0xff] %v1086_v45  ;;  %v1671_v45 = vmul.f32 %v1639_v14, %v1639_v14  ;;  %v1675_v22 = vmul.f32 %v1643_v3, %v1643_v3 }
 0x2d5   : > { %1375 = vst [vmem:[#allocation1 + $0x7] ss:$9 sm:$0xff] %v1087_v12  ;;  %v1100_v12 = vperm.slane %v2748_v56, 4 }
 0x2d6   : > { %v1714_v46 = vsel %vm328_vm0, %v1671_v45, 0.0 }
 0x2dc   : > { %v1376_v44 = vld [vmem:[#allocation1] sm:$0xff] }
 0x2dd   : > { %1377 = vst [vmem:[#allocation1] ss:$9 sm:$0xff] %v1088_v39  ;;  %1507 = vperm.xlu2 %2114, %v1376_v44   ;;  %v1101_v39 = vperm.slane %v2748_v56, 5  ;;  %v1672_v44 = vmul.f32 %v1640_v57, %v1640_v57  ;;  %v1676_v57 = vmul.f32 %v1644_v36, %v1644_v36 }
 0x2de   : > { %1378 = vst [vmem:[#allocation1 + $0x1] ss:$9 sm:$0xff] %v1089_v54  ;;  %v1712_v54 = vsel %vm328_vm0, %v1670_v24, 0.0 }
 0x2df   : > { %1379 = vst [vmem:[#allocation1 + $0x2] ss:$9 sm:$0xff] %v1090_v48  ;;  %v1102_v48 = vperm.slane %v2748_v56, 6 }
 0x2e0   : > { %1380 = vst [vmem:[#allocation1 + $0x3] ss:$9 sm:$0xff] %v1091_v38  ;;  %v1711_v38 = vadd.f32 %v1710_v35, %v1709_v9  ;;  %v1105_v35 = vperm.slane %v2742_v40, 1  ;;  %v1722_v9 = vsel %vm328_vm0, %v1675_v22, 0.0 }
 0x2e1   : > { %1381 = vst [vmem:[#allocation1 + $0x4] ss:$9 sm:$0xff] %v1092_v29  ;;  %v1103_v29 = vperm.slane %v2748_v56, 7  ;;  %v1716_v56 = vsel %vm328_vm0, %v1672_v44, 0.0 }
 0x2e2   : > { %1382 = vst [vmem:[#allocation1 + $0x5] ss:$9 sm:$0xff] %v1093_v25  ;;  %v2129_v25 = vld [vmem:[%s2349_s26 + $0x78] sm:$0xff]  ;;  %v1713_v59 = vadd.f32 %v1712_v54, %v1711_v38  ;;  %v2135_v54 = vld [vmem:[%s2349_s26 + $0xa0] sm:$0xff]  ;;  %v1108_v38 = vperm.slane %v2742_v40, 4 }
 0x2e3   : > { %1383 = vst [vmem:[#allocation1 + $0x6] ss:$9 sm:$0xff] %v1094_v51  ;;  %v1642_v51 = vsub.f32 %v2828_v60, %v2129_v25  ;;  %v1647_v44 = vsub.f32 %v2925_v34, %v2135_v54 }
 0x2e4   : > { %1384 = vst [vmem:[#allocation1 + $0x7] ss:$9 sm:$0xff] %v1095_v63  ;;  %v3021_v63 = vpop.f32.mrf.mxu2  ;;  %v1715_v60 = vadd.f32 %v1714_v46, %v1713_v59  ;;  %v1109_v59 = vperm.slane %v2742_v40, 5 }
 0x2e5   : > { %873 = vst.msk [vmem:[%s2584_s28 + $0xc8] sm:$0xff] %vm328_vm0, %v3021_v63  ;;  %v1674_v4 = vmul.f32 %v1642_v51, %v1642_v51  ;;  %v2136_v51 = vld [vmem:[%s2349_s26 + $0xa8] sm:$0xff]  ;;  %v1679_v3 = vmul.f32 %v1647_v44, %v1647_v44  ;;  %v1118_v44 = vperm.slane %v2762_v53, 6 }
 0x2e6   : > { %v1717_v14 = vadd.f32 %v1716_v56, %v1715_v60  ;;  %v1648_v46 = vsub.f32 %v2942_v1, %v2136_v51  ;;  %v2137_v56 = vld [vmem:[%s2349_s26 + $0xb0] sm:$0xff] }
 0x2e7   : > { %v1720_v49 = vsel %vm328_vm0, %v1674_v4, 0.0  ;;  %v1649_v33 = vsub.f32 %v2956_v18, %v2137_v56  ;;  %v1730_v36 = vsel %vm328_vm0, %v1679_v3, 0.0  ;;  %v842_v56 = vpop.f32.mrf.mxu3 }
 0x2e8   : > { %v1719_v24 = vadd.f32 %v1718_v31, %v1717_v14  ;;  %v1680_v4 = vmul.f32 %v1648_v46, %v1648_v46  ;;  %v2138_v14 = vld [vmem:[%s2349_s26 + $0xb8] sm:$0xff]  ;;  %v1112_v31 = vperm.slane %v2762_v53, 0  ;;  %878 = vst.msk [vmem:[%s2584_s28 + $0xf0] sm:$0xff] %vm328_vm0, %v842_v56 }
 0x2e9   : > { %v1681_v13 = vmul.f32 %v1649_v33, %v1649_v33  ;;  %v1650_v22 = vsub.f32 %v2977_v37, %v2138_v14  ;;  %v1115_v37 = vperm.slane %v2762_v53, 3  ;;  %v1121_v33 = vperm.slane %v2745_v41, 1 }
 0x2ea   : > { %v1732_v18 = vsel %vm328_vm0, %v1680_v4, 0.0  ;;  %v1124_v14 = vperm.slane %v2745_v41, 4 }
 0x2eb   : > { %v1385_v8 = vld [vmem:[#allocation1] sm:$0xff] }
 0x2ec   : > { %1510 = vperm.xlu1 %2116, %v1385_v8   ;;  %1386 = vst [vmem:[#allocation1] ss:$9 sm:$0xff] %v1096_v23  ;;  %v2133_v23 = vld [vmem:[%s2349_s26 + $0x90] sm:$0xff]  ;;  %v1104_v8 = vperm.slane %v2742_v40, 0 }
 0x2ed   : > { %1387 = vst [vmem:[#allocation1 + $0x1] ss:$9 sm:$0xff] %v1097_v19  ;;  %v1645_v19 = vsub.f32 %v2885_v50, %v2133_v23  ;;  %v1106_v50 = vperm.slane %v2742_v40, 2 }
 0x2ee   : > { %1388 = vst [vmem:[#allocation1 + $0x2] ss:$9 sm:$0xff] %v1098_v52  ;;  %v2134_v52 = vld [vmem:[%s2349_s26 + $0x98] sm:$0xff] }
 0x2ef   : > { %1389 = vst [vmem:[#allocation1 + $0x3] ss:$9 sm:$0xff] %v1099_v20  ;;  %v1646_v15 = vsub.f32 %v2905_v42, %v2134_v52  ;;  %v3041_v20 = vpop.f32.mrf.mxu2  ;;  %v1107_v42 = vperm.slane %v2742_v40, 3  ;;  %v1734_v40 = vsel %vm328_vm0, %v1681_v13, 0.0  ;;  %v1113_v52 = vperm.slane %v2762_v53, 1 }
 0x2f0   : > { %1390 = vst [vmem:[#allocation1 + $0x4] ss:$9 sm:$0xff] %v1100_v12  ;;  %v1721_v12 = vadd.f32 %v1720_v49, %v1719_v24  ;;  %v1682_v24 = vmul.f32 %v1650_v22, %v1650_v22  ;;  %v1123_v13 = vperm.slane %v2745_v41, 3  ;;  %v1125_v22 = vperm.slane %v2745_v41, 5 }
 0x2f1   : > { %1391 = vst [vmem:[#allocation1 + $0x5] ss:$9 sm:$0xff] %v1101_v39  ;;  %v1677_v39 = vmul.f32 %v1645_v19, %v1645_v19  ;;  %v1678_v25 = vmul.f32 %v1646_v15, %v1646_v15 }
 0x2f2   : > { %1392 = vst [vmem:[#allocation1 + $0x6] ss:$9 sm:$0xff] %v1102_v48  ;;  %v1723_v48 = vadd.f32 %v1722_v9, %v1721_v12  ;;  %v1736_v12 = vsel %vm328_vm0, %v1682_v24, 0.0  ;;  %v2140_v9 = vld [vmem:[%s2349_s26 + $0xc8] sm:$0xff]  ;;  %v2144_v24 = vld [vmem:[%s2349_s26 + $0xf0] sm:$0xff] }
 0x2f3   : > { %1393 = vst [vmem:[#allocation1 + $0x7] ss:$9 sm:$0xff] %v1103_v29  ;;  %v1724_v29 = vsel %vm328_vm0, %v1676_v57, 0.0  ;;  %v1726_v2 = vsel %vm328_vm0, %v1677_v39, 0.0  ;;  %v1728_v1 = vsel %vm328_vm0, %v1678_v25, 0.0  ;;  %v1117_v39 = vperm.slane %v2762_v53, 5 }
 0x2f4   : > { %874 = vst.msk [vmem:[%s2584_s28 + $0xd0] sm:$0xff] %vm328_vm0, %v3041_v20  ;;  %v1725_v34 = vadd.f32 %v1724_v29, %v1723_v48  ;;  %v2141_v25 = vld [vmem:[%s2349_s26 + $0xd0] sm:$0xff] }
 0x2f6   : > { %v1727_v60 = vadd.f32 %v1726_v2, %v1725_v34  ;;  %v2142_v34 = vld [vmem:[%s2349_s26 + $0xd8] sm:$0xff]  ;;  %v1120_v2 = vperm.slane %v2745_v41, 0 }
 0x2f7   : > { %v833_v48 = vpop.f32.mrf.mxu2 }
 0x2f8   : > { %v1729_v7 = vadd.f32 %v1728_v1, %v1727_v60  ;;  %875 = vst.msk [vmem:[%s2584_s28 + $0xd8] sm:$0xff] %vm328_vm0, %v833_v48  ;;  %v2143_v1 = vld [vmem:[%s2349_s26 + $0xe0] sm:$0xff] }
 0x2fa   : > { %v1394_v45 = vld [vmem:[#allocation1] sm:$0xff]  ;;  %v1731_v23 = vadd.f32 %v1730_v36, %v1729_v7  ;;  %v1122_v7 = vperm.slane %v2745_v41, 2 }
 0x2fb   : > { %1513 = vperm.xlu2 %2114, %v1394_v45   ;;  %1395 = vst [vmem:[#allocation1] ss:$9 sm:$0xff] %v1104_v8  ;;  %v2139_v8 = vld [vmem:[%s2349_s26 + $0xc0] sm:$0xff]  ;;  %v1116_v45 = vperm.slane %v2762_v53, 4 }
 0x2fc   : > { %1396 = vst [vmem:[#allocation1 + $0x1] ss:$9 sm:$0xff] %v1105_v35  ;;  %v1733_v19 = vadd.f32 %v1732_v18, %v1731_v23  ;;  %v1651_v49 = vsub.f32 %v2992_v47, %v2139_v8  ;;  %v1114_v35 = vperm.slane %v2762_v53, 2  ;;  %v1652_v47 = vsub.f32 %v3021_v63, %v2140_v9 }
 0x2fd   : > { %1397 = vst [vmem:[#allocation1 + $0x2] ss:$9 sm:$0xff] %v1106_v50  ;;  %v1653_v63 = vsub.f32 %v3041_v20, %v2141_v25  ;;  %v1657_v8 = vsub.f32 %v842_v56, %v2144_v24  ;;  %v1130_v25 = vperm.slane %v2758_v26, 2  ;;  %v1572_v24 = vadd.s32 4294967200, %v2524_v32 }
 0x2fe   : > { %1398 = vst [vmem:[#allocation1 + $0x3] ss:$9 sm:$0xff] %v1107_v42  ;;  %v1735_v57 = vadd.f32 %v1734_v40, %v1733_v19  ;;  %v1683_v50 = vmul.f32 %v1651_v49, %v1651_v49  ;;  %v1119_v42 = vperm.slane %v2762_v53, 7  ;;  %v1684_v29 = vmul.f32 %v1652_v47, %v1652_v47 }
 0x2ff   : > { %1399 = vst [vmem:[#allocation1 + $0x4] ss:$9 sm:$0xff] %v1108_v38  ;;  %v1654_v53 = vsub.f32 %v833_v48, %v2142_v34  ;;  %v836_v3 = vpop.f32.mrf.mxu2  ;;  %v1126_v19 = vperm.slane %v2745_v41, 6  ;;  %v1129_v48 = vperm.slane %v2758_v26, 1  ;;  %v1134_v34 = vperm.slane %v2758_v26, 6 }
 0x300   : > { %1400 = vst [vmem:[#allocation1 + $0x5] ss:$9 sm:$0xff] %v1109_v59  ;;  %v1737_v54 = vadd.f32 %v1736_v12, %v1735_v57  ;;  %v1738_v38 = vsel %vm328_vm0, %v1683_v50, 0.0  ;;  %v1740_v46 = vsel %vm328_vm0, %v1684_v29, 0.0  ;;  %v1685_v59 = vmul.f32 %v1653_v63, %v1653_v63  ;;  %v845_v57 = vpop.f32.mrf.mxu3 }
 0x301   : > { %1401 = vst [vmem:[#allocation1 + $0x6] ss:$9 sm:$0xff] %v1110_v62  ;;  %v1686_v60 = vmul.f32 %v1654_v53, %v1654_v53  ;;  %v1655_v4 = vsub.f32 %v836_v3, %v2143_v1  ;;  %v1689_v50 = vmul.f32 %v1657_v8, %v1657_v8  ;;  %v1131_v63 = vperm.slane %v2758_v26, 3 }
 0x302   : > { %1402 = vst [vmem:[#allocation1 + $0x7] ss:$9 sm:$0xff] %v1111_v28  ;;  %v1739_v51 = vadd.f32 %v1738_v38, %v1737_v54  ;;  %v1742_v20 = vsel %vm328_vm0, %v1685_v59, 0.0  ;;  %v1128_v54 = vperm.slane %v2758_v26, 0  ;;  %v1133_v59 = vperm.slane %v2758_v26, 5 }
 0x303   : > { %876 = vst.msk [vmem:[%s2584_s28 + $0xe0] sm:$0xff] %vm328_vm0, %v836_v3  ;;  %v1744_v23 = vsel %vm328_vm0, %v1686_v60, 0.0  ;;  %v1687_v18 = vmul.f32 %v1655_v4, %v1655_v4  ;;  %v1135_v53 = vperm.slane %v2758_v26, 7  ;;  %v1472_v3 = vpop.permute.xlu1 %1471 }
 0x304   : > { %v1741_v62 = vadd.f32 %v1740_v46, %v1739_v51  ;;  %879 = vst.msk [vmem:[%s2584_s28 + $0xf8] sm:$0xff] %vm328_vm0, %v845_v57  ;;  %v1132_v46 = vperm.slane %v2758_v26, 4 }
 0x306   : > { %v1743_v36 = vadd.f32 %v1742_v20, %v1741_v62 }
 0x307   : > { %v839_v49 = vpop.f32.mrf.mxu2 }
 0x308   : > { %v1745_v40 = vadd.f32 %v1744_v23, %v1743_v36  ;;  %877 = vst.msk [vmem:[%s2584_s28 + $0xe8] sm:$0xff] %vm328_vm0, %v839_v49  ;;  %s2167_s28 = scalar_lea.hbm %s3222_s5, 4 }
 0x309   : > { %v1403_v15 = vld [vmem:[#allocation1] sm:$0xff]  ;;  %p2169_p1 = scmp.lt.s32.totalorder %s2167_s28, %s2163_s17 }
 0x30a   : > { %1516 = vperm.xlu1 %2116, %v1403_v15   ;;  %1404 = vst [vmem:[#allocation1] ss:$9 sm:$0xff] %v1112_v31  ;;  %v1127_v31 = vperm.slane %v2745_v41, 7  ;;  %v2145_v15 = vld [vmem:[%s2349_s26 + $0xe8] sm:$0xff] }
 0x30b   : > { %1405 = vst [vmem:[#allocation1 + $0x1] ss:$9 sm:$0xff] %v1113_v52  ;;  %v1746_v52 = vsel %vm328_vm0, %v1687_v18, 0.0  ;;  %p2170_p2 = por %p2169_p1, %p2168_p0 }
 0x30c   : > { %1406 = vst [vmem:[#allocation1 + $0x2] ss:$9 sm:$0xff] %v1114_v35  ;;  %v1656_v35 = vsub.f32 %v839_v49, %v2145_v15  ;;  %v1747_v12 = vadd.f32 %v1746_v52, %v1745_v40  ;;  %v1576_v52 = vadd.s32 4294967192, %v2524_v32 }
 0x30d   : > { %1407 = vst [vmem:[#allocation1 + $0x3] ss:$9 sm:$0xff] %v1115_v37  ;;  %v2146_v37 = vld [vmem:[%s2349_s26 + $0xf8] sm:$0xff]  ;;  %s1925_s26 = sshll.u32 %s3157_s13, 1  ;;  %p2171_p3 = pnand %p2170_p2, %p2166_p13 }
 0x30e   : > { %1408 = vst [vmem:[#allocation1 + $0x4] ss:$9 sm:$0xff] %v1116_v45  ;;  %v1658_v45 = vsub.f32 %v845_v57, %v2146_v37  ;;  %v1688_v41 = vmul.f32 %v1656_v35, %v1656_v35  ;;  %v1568_v37 = vadd.s32 4294967208, %v2524_v32  ;;  %s256_s11 = scalar_lea.vmem [#allocation2], %s1925_s26 }
 0x30f   : > { %1409 = vst [vmem:[#allocation1 + $0x5] ss:$9 sm:$0xff] %v1117_v39  ;;  %s1793_s12 = sshll.u32 %s256_s11, 4  ;;  %s1794_s12 = int_to_ptr.vmem [resolvable:$true] %s1793_s12 }
 0x310   : > { %1410 = vst [vmem:[#allocation1 + $0x6] ss:$9 sm:$0xff] %v1118_v44  ;;  %v1690_v9 = vmul.f32 %v1658_v45, %v1658_v45  ;;  %v1748_v47 = vsel %vm328_vm0, %v1688_v41, 0.0  ;;  %v1750_v44 = vsel %vm328_vm0, %v1689_v50, 0.0 }
 0x311   : > { %1411 = vst [vmem:[#allocation1 + $0x7] ss:$9 sm:$0xff] %v1119_v42  ;;  %v1749_v39 = vadd.f32 %v1748_v47, %v1747_v12 }
 0x312   : > { %v1752_v42 = vsel %vm328_vm0, %v1690_v9, 0.0  ;;  %vm1570_vm0 = vcmask 786112  }
 0x313   : > { %v1751_v29 = vadd.f32 %v1750_v44, %v1749_v39 }
 0x315   : > { %v1753_v51 = vadd.f32 %v1752_v42, %v1751_v29 }
 0x317   : > { %1754 = vadd.xlane.f32.xlu0 %v1753_v51 }
 0x318   : > { %v3091_v28 = vld [vmem:[#allocation1] sm:$0xff] }
 0x319   : > { %1413 = vst [vmem:[#allocation1] ss:$9 sm:$0xff] %v1120_v2  ;;  %v1469_v2 = vpop.permute.xlu2 %1468 }
 0x31a   : > { %1414 = vst [vmem:[#allocation1 + $0x1] ss:$9 sm:$0xff] %v1121_v33  ;;  %v1481_v33 = vpop.permute.xlu1 %1480  ;;  %v1573_v12 = vperm.slane %v1469_v2, %v1572_v24 }
 0x31b   : > { %1415 = vst [vmem:[#allocation1 + $0x2] ss:$9 sm:$0xff] %v1122_v7 }
 0x31c   : > { %1416 = vst [vmem:[#allocation1 + $0x3] ss:$9 sm:$0xff] %v1123_v13 }
 0x31d   : > { %1417 = vst [vmem:[#allocation1 + $0x4] ss:$9 sm:$0xff] %v1124_v14 }
 0x31e   : > { %1418 = vst [vmem:[#allocation1 + $0x5] ss:$9 sm:$0xff] %v1125_v22 }
 0x31f   : > { %1419 = vst [vmem:[#allocation1 + $0x6] ss:$9 sm:$0xff] %v1126_v19  ;;  %v1588_v19 = vperm.slane %v1481_v33, %v2524_v32 }
 0x320   : > { %1420 = vst [vmem:[#allocation1 + $0x7] ss:$9 sm:$0xff] %v1127_v31 }
 0x321   : > { %v3127_v56 = vpop.permute.xlu2 %1477 }
 0x322   : > { %v1487_v60 = vpop.permute.xlu1 %1486 }
 0x323   : > { %v1591_v40 = vperm.slane %v1487_v60, %v2768_v58 }
 0x327   : > { %v1421_v38 = vld [vmem:[#allocation1] sm:$0xff] }
 0x328   : > { %1522 = vperm.xlu2 %2114, %v1421_v38   ;;  %1422 = vst [vmem:[#allocation1] ss:$9 sm:$0xff] %v1128_v54 }
 0x329   : > { %1423 = vst [vmem:[#allocation1 + $0x1] ss:$9 sm:$0xff] %v1129_v48  ;;  %v1484_v20 = vpop.permute.xlu2 %1483 }
 0x32a   : > { %1424 = vst [vmem:[#allocation1 + $0x2] ss:$9 sm:$0xff] %v1130_v25  ;;  %v1493_v26 = vpop.permute.xlu1 %1492  ;;  %v1589_v31 = vperm.slane %v1484_v20, %v2775_v5 }
 0x32b   : > { %1425 = vst [vmem:[#allocation1 + $0x3] ss:$9 sm:$0xff] %v1131_v63  ;;  %1465 = vperm.xlu0 %2115, %v2662_v43   ;;  %v1595_v57 = vperm.slane %v1493_v26, %v2802_v21  ;;  %v1577_v21 = vperm.slane %v1472_v3, %v1576_v52 }
 0x32c   : > { %1426 = vst [vmem:[#allocation1 + $0x4] ss:$9 sm:$0xff] %v1132_v46  ;;  %v1590_v8 = vsel %vm1530_vm14, %v1589_v31, %v1588_v19  ;;  %vm1574_vm14 = vcmask 851712  }
 0x32d   : > { %1427 = vst [vmem:[#allocation1 + $0x5] ss:$9 sm:$0xff] %v1133_v59  ;;  %v1592_v49 = vsel %vm1534_vm15, %v1591_v40, %v1590_v8  ;;  %vm1582_vm15 = vcmask 982912  }
 0x32e   : > { %1428 = vst [vmem:[#allocation1 + $0x6] ss:$9 sm:$0xff] %v1134_v34 }
 0x32f   : > { %1429 = vst [vmem:[#allocation1 + $0x7] ss:$9 sm:$0xff] %v1135_v53 }
 0x331   : > { %v1490_v1 = vpop.permute.xlu2 %1489 }
 0x332   : > { %v1499_v13 = vpop.permute.xlu1 %1498  ;;  %v1593_v15 = vperm.slane %v1490_v1, %v2772_v61 }
 0x333   : > { %1474 = vperm.xlu0 %2115, %v2708_v16   ;;  %v1599_v9 = vperm.slane %v1499_v13, %v2844_v11 }
 0x334   : > { %v1594_v5 = vsel %vm1538_vm2, %v1593_v15, %v1592_v49  ;;  %vm1620_vm2 = vcmask 1040384  }
 0x335   : > { %v1596_v41 = vsel %vm1542_vm4, %v1595_v57, %v1594_v5 }
 0x336   : > { %v1430_v62 = vld [vmem:[#allocation1] sm:$0xff] }
 0x337   : > { %1525 = vperm.xlu1 %2116, %v1430_v62  }
 0x339   : > { %v1496_v36 = vpop.permute.xlu2 %1495 }
 0x33a   : > { %v1597_v47 = vperm.slane %v1496_v36, %v2849_v17 }
 0x33b   : > { %1519 = vperm.xlu0 %2115, %v3091_v28  }
 0x33c   : > { %v1598_v54 = vsel %vm1546_vm7, %v1597_v47, %v1596_v41 }
 0x33d   : > { %v1600_v42 = vsel %vm1550_vm8, %v1599_v9, %v1598_v54 }
 0x340   : > { %v1505_v18 = vpop.permute.xlu1 %1504 }
 0x341   : > { %v1502_v16 = vpop.permute.xlu2 %1501  ;;  %v1603_v11 = vperm.slane %v1505_v18, %v2902_v55 }
 0x342   : > { %v1601_v48 = vperm.slane %v1502_v16, %v2882_v0  ;;  %v1580_v0 = vadd.s32 4294967184, %v2524_v32 }
 0x344   : > { %v1602_v25 = vsel %vm1554_vm9, %v1601_v48, %v1600_v42 }
 0x349   : > { %v1508_v35 = vpop.permute.xlu2 %1507 }
 0x34a   : > { %v1605_v51 = vperm.slane %v1508_v35, %v2898_v6 }
 0x355   : > { %v1514_v38 = vpop.permute.xlu2 %1513 }
 0x356   : > { %v1609_v34 = vperm.slane %v1514_v38, %v1568_v37 }
 0x35e   : > { %v1511_v45 = vpop.permute.xlu1 %1510 }
 0x35f   : > { %v1607_v63 = vperm.slane %v1511_v45, %v2939_v27  ;;  %v1584_v27 = vadd.s32 4294967176, %v2524_v32 }
 0x361   : > { %v1585_v36 = vperm.slane %v3127_v56, %v1584_v27 }
 0x37c   : > { %v1517_v17 = vpop.permute.xlu1 %1516 }
 0x37d   : > { %v1611_v59 = vperm.slane %v1517_v17, %v1572_v24 }
 0x382   : > { %v1523_v53 = vpop.permute.xlu2 %1522 }
 0x383   : > { %v1615_v20 = vperm.slane %v1523_v53, %v1580_v0 }
 0x38a   : > { %v1755_v4 = vpop.xlane.xlu0 %1754 }
 0x38b   : > { %v1756_v7 = vrot.slane %v1755_v4, 4 }
 0x38d   : > { %v1757_v14 = vadd.f32 %v1756_v7, %v1755_v4 }
 0x38f   : > { %v1758_v22 = vrot.slane %v1757_v14, 2 }
 0x391   : > { %v1759_v43 = vadd.f32 %v1758_v22, %v1757_v14 }
 0x393   : > { %v1760_v23 = vrot.slane %v1759_v43, 1 }
 0x395   : > { %v1761_v28 = vadd.f32 %v1760_v23, %v1759_v43 }
 0x397   : > { %2066 = vpush %v1761_v28 }
 0x39d   : > { %v1466_v58 = vpop.permute.xlu0 %1465 }
 0x39e   : > { %v1569_v50 = vperm.slane %v1466_v58, %v1568_v37 }
 0x3a0   : > { %v1571_v61 = vsel %vm1570_vm0, %v1569_v50, %v2951_v10  ;;  %v1604_v10 = vsel %vm1558_vm10, %v1603_v11, %v1602_v25 }
 0x3a1   : > { %v1575_v39 = vsel %vm1574_vm14, %v1573_v12, %v1571_v61  ;;  %v1606_v46 = vsel %vm1562_vm11, %v1605_v51, %v1604_v10 }
 0x3a2   : > { %v1579_v44 = vsel %vm1578_vm13, %v1577_v21, %v1575_v39  ;;  %v1608_v55 = vsel %vm1566_vm12, %v1607_v63, %v1606_v46 }
 0x3a3   : > { %v1610_v6 = vsel %vm1570_vm0, %v1609_v34, %v1608_v55 }
 0x3a4   : > { %v1612_v60 = vsel %vm1574_vm14, %v1611_v59, %v1610_v6 }
 0x3a5   : > { %v1475_v29 = vpop.permute.xlu0 %1474 }
 0x3a6   : > { %v1581_v2 = vperm.slane %v1475_v29, %v1580_v0 }
 0x3a8   : > { %v1583_v4 = vsel %vm1582_vm15, %v1581_v2, %v1579_v44 }
 0x3a9   : > { %v1526_v62 = vpop.permute.xlu1 %1525  ;;  %v1587_v22 = vsel %vm1586_vm1, %v1585_v36, %v1583_v4 }
 0x3aa   : > { %v1617_v1 = vperm.slane %v1526_v62, %v1584_v27 }
 0x3ad   : > { %v1520_v3 = vpop.permute.xlu0 %1519 }
 0x3ae   : > { %v1613_v33 = vperm.slane %v1520_v3, %v1576_v52 }
 0x3b0   : > { %v1614_v26 = vsel %vm1578_vm13, %v1613_v33, %v1612_v60 }
 0x3b1   : > { %v1616_v7 = vsel %vm1582_vm15, %v1615_v20, %v1614_v26 }
 0x3b2   : > { %v1618_v13 = vsel %vm1586_vm1, %v1617_v1, %v1616_v7 }
 0x3b3   : > { %v1619_v14 = vrot.slane %v1618_v13, 7 }
 0x3b5   : > { %v1621_v43 = vsel %vm1620_vm2, %v1587_v22, %v1619_v14 }
 0x3b6   : > { %1626 = vst.msk [vmem:[%s256_s11] sm:$0x3] %vm1624_vm3, %v1621_v43 }
 0x3b7   : > { %2174 = shalt.err (!%p2171_p3)
}
 0x3b8   : > { %2068 = dma.vmem_to_hbm [thread:$0]  (%p2318_p5), %s1794_s12, 32, %s1796_s14, %s1773_s15   ;;  %vm1763_vm4 = vcmp.eq.s32.totalorder %v2524_v32, 0 }
 0x3b9   : > { %s1804_s10 = scalar_lea.hbm %s3223_s6, %s2301_s25  ;;  %s262_s11 = scalar_lea.vmem [#allocation4], %s3157_s13 }
 0x3ba   : > { %s1806_s19 = sshll.u32 %s262_s11, 4  ;;  %s1808_s20 = sshll.u32 %s1804_s10, 4  ;;  %s1807_s19 = int_to_ptr.vmem [resolvable:$true] %s1806_s19  ;;  %s1809_s20 = int_to_ptr.hbm [resolvable:$true] %s1808_s20 }
 0x3bb   : > { %s1778_s17 = scalar_lea.sflag [#allocation5], %s3157_s13  ;;  %s2189_s28 = sshra.s32 %s1809_s20, 4  ;;  %s2190_s28 = int_to_ptr.hbm [resolvable:$true] %s2189_s28 }
 0x3bc   : > { %s2191_s12 = scalar_lea.hbm %s2190_s28, 1  ;;  %s2195_s15 = scalar_lea.hbm %s3223_s6, 2 }
 0x3bd   : > { %p2192_p4 = scmp.ne.s32.totalorder %s2190_s28, %s2191_s12  ;;  %p2196_p9 = scmp.lt.s32.totalorder %s2190_s28, %s3223_s6 }
 0x3be   : > { %p2197_p10 = scmp.lt.s32.totalorder %s2195_s15, %s2191_s12 }
 0x3bf   : > { %p2193_p7 = pnand %p2192_p4, %p2318_p5 }
 0x3c0   : > { %p2198_p11 = por %p2197_p10, %p2196_p9 }
 0x3c1   : > { %p2194_p8 = pneg %p2193_p7 }
 0x3c3   : > { %p2199_p12 = pnand %p2198_p11, %p2194_p8 }
 0x3c8   : > { %s2067_s16 = spop %2066 }
 0x3c9   : > { %v1764_v30 = vstv %s2067_s16 }
 0x3ca   : > { %v1765_v56 = vsel %vm1763_vm4, %v1764_v30, 0.0 }
 0x3cb   : > { %1766 = vst [vmem:[%s262_s11] sm:$0x1] %v1765_v56 }
 0x3cc   : > { %2202 = shalt.err (!%p2199_p12)
}
 0x3cd   : > { %2069 = dma.vmem_to_hbm [thread:$0]  (%p2318_p5), %s1807_s19, 16, %s1809_s20, %s1778_s17  }
 0x3ce PF: > { %p2079_p13 = scmp.ge.s32.totalorder %s2241_s24, 2  ;;  %s1828_s13 = sand.u32 1, %s2229_s21  }
 0x3cf   : > { %s1829_s29 = scalar_lea.sflag [#allocation3], %s1828_s13 }
 0x3d0   : > { %p2073_p0 = pnand %p2079_p13, %p2322_p6 }
 0x3d2   : > { %p2074_p1 = pneg %p2073_p0 }
 0x3d4   : > { %2220 = dma.done.wait (%p2074_p1), %s1829_s29, 32  }
 0x3d5   : > { %2222 = vsyncadd (%p2074_p1), %s1829_s29, 4294967264  ;;  %s1839_s9 = scalar_lea.sflag [#allocation5], %s1828_s13 }
 0x3d6   : > { %2224 = dma.done.wait (%p2074_p1), %s1839_s9, 16  }
 0x3d7   : > { %2226 = vsyncadd (%p2074_p1), %s1839_s9, 4294967280  ;;  %p20_p5 = scmp.ge.s32.totalorder %s2305_s27, 4   ;;  %s3226_s21 = smov %s2233_s22 }
 0x3d8   : > { %s3227_s22 = smov %s2237_s23  ;;  %s3228_s23 = smov %s2316_s30 }
 0x3d9   : > { %s3229_s24 = smov %s2305_s27  ;;  %22 = sbr.rel (!%p20_p5) target bundleno = 5 (0x5), region = 107 }
 0x3de   :  { %1844 = vsyncpa [#allocation3], 1 }
 0x3df   :  { %1846 = vsyncpa [#allocation3 + $0x1], 1 }
 0x3e0   :  { %1847 = vsyncpa [#allocation5], 1 }
 0x3e1   :  { %1849 = vsyncpa [#allocation5 + $0x1], 1 }

</bundles_post_ra>
